<compile_context>
chip_gen: v6e
topology: v6e:2x2x1
jax: 0.10.0
libtpu: 0.0.40
codegen_flags: <defaults>
</compile_context>

<pallas_src>
import functools

import jax
import jax.numpy as jnp
from jax.experimental import pallas as pl
from jax.experimental.pallas import tpu as pltpu

LANE = 128


# ----------------------------- Pallas kernel --------------------------------


def _sage_layer_kernel(a_ref, xk_ref, xi_ref, ws_ref, wn_ref, b_ref, *rest,
                       apply_relu, fuse_fc):
    """One row-tile of a fused SAGEConv('mean') layer (+ optional fused fc)."""
    if fuse_fc:
        wfc_ref, bfc_ref, o_ref, acc_ref = rest
    else:
        o_ref, acc_ref = rest

    k = pl.program_id(1)

    @pl.when(k == 0)
    def _():
        acc_ref[...] = jnp.zeros_like(acc_ref)

    # Partial mean aggregation: acc += A_norm[i-tile, k-tile] @ X[k-tile, :]
    # (bf16 x bf16 on the MXU, f32 accumulation in VMEM scratch)
    acc_ref[...] += jnp.dot(a_ref[...], xk_ref[...],
                            preferred_element_type=jnp.float32)

    @pl.when(k == pl.num_programs(1) - 1)
    def _():
        x_i = xi_ref[...]                                    # (TM, F_in)  bf16
        agg = acc_ref[...].astype(jnp.bfloat16)              # (TM, F_in)  bf16
        # Two MXU contractions summed in f32 (no concat copy).
        h = jnp.dot(x_i, ws_ref[...], preferred_element_type=jnp.float32)
        h = h + jnp.dot(agg, wn_ref[...], preferred_element_type=jnp.float32)
        h = h + b_ref[...].astype(jnp.float32)
        if apply_relu:
            h = jnp.maximum(h, 0.0)
        if fuse_fc:
            h = jnp.dot(h.astype(jnp.bfloat16), wfc_ref[...],
                        preferred_element_type=jnp.float32)
            h = h + bfc_ref[...].astype(jnp.float32)
        o_ref[...] = h.astype(o_ref.dtype)


# ------------------------------ JAX wrappers ---------------------------------


def sage_layer(a_norm, x, w_self, w_neigh, bias, *, apply_relu=True,
               fc_w=None, fc_b=None, out_dtype=jnp.bfloat16, tm=128, tk=128):
    n, f_in = x.shape
    assert a_norm.shape == (n, n)
    assert n % tm == 0 and n % tk == 0, "pad node count to a multiple of the tile sizes"
    assert w_self.shape == w_neigh.shape and w_self.shape[0] == f_in
    f_out = w_self.shape[1]
    fuse_fc = fc_w is not None
    c_out = fc_w.shape[1] if fuse_fc else f_out

    kernel = functools.partial(_sage_layer_kernel,
                               apply_relu=apply_relu, fuse_fc=fuse_fc)

    in_specs = [
        pl.BlockSpec((tm, tk), lambda i, k: (i, k)),          # A_norm tile
        pl.BlockSpec((tk, f_in), lambda i, k: (k, 0)),        # X rows feeding aggregation
        pl.BlockSpec((tm, f_in), lambda i, k: (i, 0)),        # X rows for the self term
        pl.BlockSpec((f_in, f_out), lambda i, k: (0, 0)),     # W_self
        pl.BlockSpec((f_in, f_out), lambda i, k: (0, 0)),     # W_neigh
        pl.BlockSpec((1, f_out), lambda i, k: (0, 0)),        # bias (fc_neigh bias in DGL)
    ]
    operands = [a_norm, x, x, w_self, w_neigh, bias]
    if fuse_fc:
        in_specs += [pl.BlockSpec((f_out, c_out), lambda i, k: (0, 0)),  # W_fc
                     pl.BlockSpec((1, c_out), lambda i, k: (0, 0))]      # b_fc
        operands += [fc_w, fc_b]

    return pl.pallas_call(
        kernel,
        out_shape=jax.ShapeDtypeStruct((n, c_out), out_dtype),
        grid_spec=pltpu.PrefetchScalarGridSpec(
            num_scalar_prefetch=0,
            grid=(n // tm, n // tk),            # (row tiles, reduction tiles) -- K last
            in_specs=in_specs,
            out_specs=pl.BlockSpec((tm, c_out), lambda i, k: (i, 0)),
            scratch_shapes=[pltpu.VMEM((tm, f_in), jnp.float32)],
        ),
        compiler_params=pltpu.CompilerParams(
            dimension_semantics=("parallel", "arbitrary"),
            vmem_limit_bytes=32 * 1024 * 1024,
        ),
    )(*operands)


def graphsage_forward(params, a_norm, x, *, tm=128, tk=128):
    h1 = sage_layer(a_norm, x, params["ws1"], params["wn1"], params["b1"],
                    apply_relu=True, out_dtype=jnp.bfloat16, tm=tm, tk=tk)
    # Second SAGE layer with the final Linear fused in (one fewer HBM round trip).
    out = sage_layer(a_norm, h1, params["ws2"], params["wn2"], params["b2"],
                     apply_relu=True, fc_w=params["w_fc"], fc_b=params["b_fc"],
                     out_dtype=jnp.float32, tm=tm, tk=tk)
    return out


# ------------------------- parameter init / packing --------------------------


def _round_up(v, m):
    return (v + m - 1) // m * m


def _pad2d(w, rows, cols):
    return jnp.pad(w, ((0, rows - w.shape[0]), (0, cols - w.shape[1])))


def _init_params(key, in_feats, h_feats, num_classes):
    ks = jax.random.split(key, 8)
    u = lambda k, shape, fan_in: (jax.random.uniform(k, shape, jnp.float32, -1.0, 1.0)
                                  / jnp.sqrt(jnp.float32(fan_in)))
    return {
        # SAGEConv 1 (fc_self has no bias, fc_neigh carries the bias, like DGL)
        "w_self1": u(ks[0], (in_feats, h_feats), in_feats),
        "w_neigh1": u(ks[1], (in_feats, h_feats), in_feats),
        "b1": u(ks[2], (1, h_feats), in_feats),
        # SAGEConv 2
        "w_self2": u(ks[3], (h_feats, h_feats), h_feats),
        "w_neigh2": u(ks[4], (h_feats, h_feats), h_feats),
        "b2": u(ks[5], (1, h_feats), h_feats),
        # fc
        "w_fc": u(ks[6], (h_feats, num_classes), h_feats),
        "b_fc": u(ks[7], (1, num_classes), h_feats),
    }


def _prepare_params(p, in_feats, h_feats, num_classes):
    """Zero-pad feature dims to 128 lanes; cast weight matrices to bf16 (biases stay f32)."""
    fp = _round_up(in_feats, LANE)
    hp = _round_up(h_feats, LANE)
    cp = _round_up(num_classes, LANE)
    w = lambda m, r, c: _pad2d(m, r, c).astype(jnp.bfloat16)
    return {
        "ws1": w(p["w_self1"], fp, hp),
        "wn1": w(p["w_neigh1"], fp, hp),
        "b1": _pad2d(p["b1"], 1, hp),
        "ws2": w(p["w_self2"], hp, hp),
        "wn2": w(p["w_neigh2"], hp, hp),
        "b2": _pad2d(p["b2"], 1, hp),
        "w_fc": w(p["w_fc"], hp, cp),
        "b_fc": _pad2d(p["b_fc"], 1, cp),
    }


# ----------------------------------- main ------------------------------------


if __name__ == "__main__":
    N = 256            # number of graph nodes (multiple of the 128 row/K tiles)
    IN_FEATS = 8
    H_FEATS = 32
    NUM_CLASSES = 4

    key = jax.random.PRNGKey(0)
    k_adj, k_feat, k_param = jax.random.split(key, 3)

    # Random graph + self loops (dgl.add_self_loop), row-normalized for 'mean' aggregation.
    adj = (jax.random.uniform(k_adj, (N, N)) < 0.05).astype(jnp.float32)
    adj = jnp.maximum(adj, jnp.eye(N, dtype=jnp.float32))
    a_norm = (adj / jnp.sum(adj, axis=1, keepdims=True)).astype(jnp.bfloat16)

    x = jax.random.normal(k_feat, (N, IN_FEATS), dtype=jnp.float32)
    x_p = _pad2d(x, N, _round_up(IN_FEATS, LANE)).astype(jnp.bfloat16)

    raw = _init_params(k_param, IN_FEATS, H_FEATS, NUM_CLASSES)
    params = _prepare_params(raw, IN_FEATS, H_FEATS, NUM_CLASSES)

    fwd = jax.jit(functools.partial(graphsage_forward, tm=128, tk=128))
    out_padded = jax.block_until_ready(fwd(params, a_norm, x_p))
    out = out_padded[:, :NUM_CLASSES]

    # Pure-JAX reference in matched precision (bf16 storage, f32 accumulation).
    f32 = jnp.float32

    def ref_layer(a, xx, ws, wn, b):
        agg = (a.astype(f32) @ xx.astype(f32)).astype(jnp.bfloat16)
        h = (xx.astype(f32) @ ws.astype(f32)
             + agg.astype(f32) @ wn.astype(f32)
             + b)
        return jnp.maximum(h, 0.0)

    h1 = ref_layer(a_norm, x_p, params["ws1"], params["wn1"], params["b1"]).astype(jnp.bfloat16)
    h2 = ref_layer(a_norm, h1, params["ws2"], params["wn2"], params["b2"]).astype(jnp.bfloat16)
    ref = (h2.astype(f32) @ params["w_fc"].astype(f32) + params["b_fc"])[:, :NUM_CLASSES]

    assert out.shape == (N, NUM_CLASSES)
    err = jnp.max(jnp.abs(out - ref))
    assert jnp.allclose(out, ref, atol=1e-2, rtol=1e-2), f"mismatch vs reference, max abs err={err}"
    print("KERNEL_OK")
</pallas_src>

<mosaic_0001>
module attributes {stable_mosaic.version = 11 : i64} {
  func.func @_sage_layer_kernel(%arg0: i32, %arg1: i32, %arg2: memref<128x128xbf16, #tpu.memory_space<vmem>>, %arg3: memref<128x128xbf16, #tpu.memory_space<vmem>>, %arg4: memref<128x128xbf16, #tpu.memory_space<vmem>>, %arg5: memref<128x128xbf16, #tpu.memory_space<vmem>>, %arg6: memref<128x128xbf16, #tpu.memory_space<vmem>>, %arg7: memref<1x128xf32, #tpu.memory_space<vmem>>, %arg8: memref<128x128xbf16, #tpu.memory_space<vmem>>, %arg9: memref<128x128xf32, #tpu.memory_space<vmem>>) attributes {dimension_semantics = [#tpu.dimension_semantics<parallel>, #tpu.dimension_semantics<arbitrary>], iteration_bounds = array<i64: 2, 2>, scalar_prefetch = 0 : i64, scratch_operands = 1 : i64, tpu.core_type = #tpu.core_type<tc>, window_params = [{transform_indices = @transform_0, window_bounds = array<i64: 128, 128>}, {transform_indices = @transform_1, window_bounds = array<i64: 128, 128>}, {transform_indices = @transform_2, window_bounds = array<i64: 128, 128>}, {pipeline_mode = #tpu.pipeline_mode<synchronous>, transform_indices = @transform_3, window_bounds = array<i64: 128, 128>}, {pipeline_mode = #tpu.pipeline_mode<synchronous>, transform_indices = @transform_4, window_bounds = array<i64: 128, 128>}, {pipeline_mode = #tpu.pipeline_mode<synchronous>, transform_indices = @transform_5, window_bounds = array<i64: 1, 128>}, {transform_indices = @transform_6, window_bounds = array<i64: 128, 128>}]} {
    %c0_i32 = arith.constant 0 : i32
    %0 = arith.cmpi eq, %arg1, %c0_i32 : i32
    %1 = arith.extui %0 : i1 to i32
    %c0_i32_0 = arith.constant 0 : i32
    %2 = arith.cmpi ne, %1, %c0_i32_0 : i32
    scf.if %2 {
      %cst_9 = arith.constant 0.000000e+00 : f32
      %12 = vector.broadcast %cst_9 : f32 to vector<128x128xf32>
      %c0_10 = arith.constant 0 : index
      %c0_11 = arith.constant 0 : index
      %13 = vector.load %arg9[%c0_10, %c0_11] : memref<128x128xf32, #tpu.memory_space<vmem>>, vector<128x128xf32>
      tpu.vector_store %arg9[%c0_10, %c0_11], %12 {strides = array<i32>} : memref<128x128xf32, #tpu.memory_space<vmem>>, vector<128x128xf32>,
    } else {
    }
    %c0 = arith.constant 0 : index
    %c0_1 = arith.constant 0 : index
    %3 = vector.load %arg9[%c0, %c0_1] : memref<128x128xf32, #tpu.memory_space<vmem>>, vector<128x128xf32>
    %c0_2 = arith.constant 0 : index
    %c0_3 = arith.constant 0 : index
    %4 = vector.load %arg2[%c0_2, %c0_3] : memref<128x128xbf16, #tpu.memory_space<vmem>>, vector<128x128xbf16>
    %c0_4 = arith.constant 0 : index
    %c0_5 = arith.constant 0 : index
    %5 = vector.load %arg3[%c0_4, %c0_5] : memref<128x128xbf16, #tpu.memory_space<vmem>>, vector<128x128xbf16>
    %cst = arith.constant dense<0.000000e+00> : vector<128x128xf32>
    %6 = tpu.matmul %4, %5, %cst {dimension_numbers = #tpu.dot_dimension_numbers<[1], [0], [0], [1], [0, 0, 1, 1], [], []>} : vector<128x128xbf16>, vector<128x128xbf16>, vector<128x128xf32> -> vector<128x128xf32>
    %7 = arith.addf %3, %6 : vector<128x128xf32>
    %c0_6 = arith.constant 0 : index
    %c0_7 = arith.constant 0 : index
    %8 = vector.load %arg9[%c0_6, %c0_7] : memref<128x128xf32, #tpu.memory_space<vmem>>, vector<128x128xf32>
    tpu.vector_store %arg9[%c0_6, %c0_7], %7 {strides = array<i32>} : memref<128x128xf32, #tpu.memory_space<vmem>>, vector<128x128xf32>,
    %c1_i32 = arith.constant 1 : i32
    %9 = arith.cmpi eq, %arg1, %c1_i32 : i32
    %10 = arith.extui %9 : i1 to i32
    %c0_i32_8 = arith.constant 0 : i32
    %11 = arith.cmpi ne, %10, %c0_i32_8 : i32
    scf.if %11 {
      %c0_9 = arith.constant 0 : index
      %c0_10 = arith.constant 0 : index
      %12 = vector.load %arg4[%c0_9, %c0_10] : memref<128x128xbf16, #tpu.memory_space<vmem>>, vector<128x128xbf16>
      %c0_11 = arith.constant 0 : index
      %c0_12 = arith.constant 0 : index
      %13 = vector.load %arg9[%c0_11, %c0_12] : memref<128x128xf32, #tpu.memory_space<vmem>>, vector<128x128xf32>
      %14 = arith.truncf %13 : vector<128x128xf32> to vector<128x128xbf16>
      %c0_13 = arith.constant 0 : index
      %c0_14 = arith.constant 0 : index
      %15 = vector.load %arg5[%c0_13, %c0_14] : memref<128x128xbf16, #tpu.memory_space<vmem>>, vector<128x128xbf16>
      %cst_15 = arith.constant dense<0.000000e+00> : vector<128x128xf32>
      %16 = tpu.matmul %12, %15, %cst_15 {dimension_numbers = #tpu.dot_dimension_numbers<[1], [0], [0], [1], [0, 0, 1, 1], [], []>} : vector<128x128xbf16>, vector<128x128xbf16>, vector<128x128xf32> -> vector<128x128xf32>
      %c0_16 = arith.constant 0 : index
      %c0_17 = arith.constant 0 : index
      %17 = vector.load %arg6[%c0_16, %c0_17] : memref<128x128xbf16, #tpu.memory_space<vmem>>, vector<128x128xbf16>
      %cst_18 = arith.constant dense<0.000000e+00> : vector<128x128xf32>
      %18 = tpu.matmul %14, %17, %cst_18 {dimension_numbers = #tpu.dot_dimension_numbers<[1], [0], [0], [1], [0, 0, 1, 1], [], []>} : vector<128x128xbf16>, vector<128x128xbf16>, vector<128x128xf32> -> vector<128x128xf32>
      %19 = arith.addf %16, %18 : vector<128x128xf32>
      %c0_19 = arith.constant 0 : index
      %c0_20 = arith.constant 0 : index
      %20 = vector.load %arg7[%c0_19, %c0_20] : memref<1x128xf32, #tpu.memory_space<vmem>>, vector<1x128xf32>
      %21 = vector.broadcast %20 : vector<1x128xf32> to vector<128x128xf32>
      %22 = arith.addf %19, %21 : vector<128x128xf32>
      %cst_21 = arith.constant 0.000000e+00 : f32
      %23 = vector.broadcast %cst_21 : f32 to vector<128x128xf32>
      %24 = arith.maximumf %22, %23 : vector<128x128xf32>
      %25 = arith.truncf %24 : vector<128x128xf32> to vector<128x128xbf16>
      %c0_22 = arith.constant 0 : index
      %c0_23 = arith.constant 0 : index
      %26 = vector.load %arg8[%c0_22, %c0_23] : memref<128x128xbf16, #tpu.memory_space<vmem>>, vector<128x128xbf16>
      tpu.vector_store %arg8[%c0_22, %c0_23], %25 {strides = array<i32>} : memref<128x128xbf16, #tpu.memory_space<vmem>>, vector<128x128xbf16>,
    } else {
    }
    return
  }
  func.func @transform_0(%arg0: i32, %arg1: i32) -> (i32, i32) {
    %c0_i32 = arith.constant 0 : i32
    return %arg0, %arg1 : i32, i32
  }
  func.func @transform_1(%arg0: i32, %arg1: i32) -> (i32, i32) {
    %c0_i32 = arith.constant 0 : i32
    %c0_i32_0 = arith.constant 0 : i32
    return %arg1, %c0_i32 : i32, i32
  }
  func.func @transform_2(%arg0: i32, %arg1: i32) -> (i32, i32) {
    %c0_i32 = arith.constant 0 : i32
    %c0_i32_0 = arith.constant 0 : i32
    return %arg0, %c0_i32 : i32, i32
  }
  func.func @transform_3(%arg0: i32, %arg1: i32) -> (i32, i32) {
    %c0_i32 = arith.constant 0 : i32
    %c0_i32_0 = arith.constant 0 : i32
    %c0_i32_1 = arith.constant 0 : i32
    return %c0_i32, %c0_i32_0 : i32, i32
  }
  func.func @transform_4(%arg0: i32, %arg1: i32) -> (i32, i32) {
    %c0_i32 = arith.constant 0 : i32
    %c0_i32_0 = arith.constant 0 : i32
    %c0_i32_1 = arith.constant 0 : i32
    return %c0_i32, %c0_i32_0 : i32, i32
  }
  func.func @transform_5(%arg0: i32, %arg1: i32) -> (i32, i32) {
    %c0_i32 = arith.constant 0 : i32
    %c0_i32_0 = arith.constant 0 : i32
    %c0_i32_1 = arith.constant 0 : i32
    return %c0_i32, %c0_i32_0 : i32, i32
  }
  func.func @transform_6(%arg0: i32, %arg1: i32) -> (i32, i32) {
    %c0_i32 = arith.constant 0 : i32
    %c0_i32_0 = arith.constant 0 : i32
    return %arg0, %c0_i32 : i32, i32
  }
}

module attributes {stable_mosaic.version = 11 : i64} {
  func.func @_sage_layer_kernel(%arg0: i32, %arg1: i32, %arg2: memref<128x128xbf16, #tpu.memory_space<vmem>>, %arg3: memref<128x128xbf16, #tpu.memory_space<vmem>>, %arg4: memref<128x128xbf16, #tpu.memory_space<vmem>>, %arg5: memref<128x128xbf16, #tpu.memory_space<vmem>>, %arg6: memref<128x128xbf16, #tpu.memory_space<vmem>>, %arg7: memref<1x128xf32, #tpu.memory_space<vmem>>, %arg8: memref<128x128xbf16, #tpu.memory_space<vmem>>, %arg9: memref<1x128xf32, #tpu.memory_space<vmem>>, %arg10: memref<128x128xf32, #tpu.memory_space<vmem>>, %arg11: memref<128x128xf32, #tpu.memory_space<vmem>>) attributes {dimension_semantics = [#tpu.dimension_semantics<parallel>, #tpu.dimension_semantics<arbitrary>], iteration_bounds = array<i64: 2, 2>, scalar_prefetch = 0 : i64, scratch_operands = 1 : i64, tpu.core_type = #tpu.core_type<tc>, window_params = [{transform_indices = @transform_0, window_bounds = array<i64: 128, 128>}, {transform_indices = @transform_1, window_bounds = array<i64: 128, 128>}, {transform_indices = @transform_2, window_bounds = array<i64: 128, 128>}, {pipeline_mode = #tpu.pipeline_mode<synchronous>, transform_indices = @transform_3, window_bounds = array<i64: 128, 128>}, {pipeline_mode = #tpu.pipeline_mode<synchronous>, transform_indices = @transform_4, window_bounds = array<i64: 128, 128>}, {pipeline_mode = #tpu.pipeline_mode<synchronous>, transform_indices = @transform_5, window_bounds = array<i64: 1, 128>}, {pipeline_mode = #tpu.pipeline_mode<synchronous>, transform_indices = @transform_6, window_bounds = array<i64: 128, 128>}, {pipeline_mode = #tpu.pipeline_mode<synchronous>, transform_indices = @transform_7, window_bounds = array<i64: 1, 128>}, {transform_indices = @transform_8, window_bounds = array<i64: 128, 128>}]} {
    %c0_i32 = arith.constant 0 : i32
    %0 = arith.cmpi eq, %arg1, %c0_i32 : i32
    %1 = arith.extui %0 : i1 to i32
    %c0_i32_0 = arith.constant 0 : i32
    %2 = arith.cmpi ne, %1, %c0_i32_0 : i32
    scf.if %2 {
      %cst_9 = arith.constant 0.000000e+00 : f32
      %12 = vector.broadcast %cst_9 : f32 to vector<128x128xf32>
      %c0_10 = arith.constant 0 : index
      %c0_11 = arith.constant 0 : index
      %13 = vector.load %arg11[%c0_10, %c0_11] : memref<128x128xf32, #tpu.memory_space<vmem>>, vector<128x128xf32>
      tpu.vector_store %arg11[%c0_10, %c0_11], %12 {strides = array<i32>} : memref<128x128xf32, #tpu.memory_space<vmem>>, vector<128x128xf32>,
    } else {
    }
    %c0 = arith.constant 0 : index
    %c0_1 = arith.constant 0 : index
    %3 = vector.load %arg11[%c0, %c0_1] : memref<128x128xf32, #tpu.memory_space<vmem>>, vector<128x128xf32>
    %c0_2 = arith.constant 0 : index
    %c0_3 = arith.constant 0 : index
    %4 = vector.load %arg2[%c0_2, %c0_3] : memref<128x128xbf16, #tpu.memory_space<vmem>>, vector<128x128xbf16>
    %c0_4 = arith.constant 0 : index
    %c0_5 = arith.constant 0 : index
    %5 = vector.load %arg3[%c0_4, %c0_5] : memref<128x128xbf16, #tpu.memory_space<vmem>>, vector<128x128xbf16>
    %cst = arith.constant dense<0.000000e+00> : vector<128x128xf32>
    %6 = tpu.matmul %4, %5, %cst {dimension_numbers = #tpu.dot_dimension_numbers<[1], [0], [0], [1], [0, 0, 1, 1], [], []>} : vector<128x128xbf16>, vector<128x128xbf16>, vector<128x128xf32> -> vector<128x128xf32>
    %7 = arith.addf %3, %6 : vector<128x128xf32>
    %c0_6 = arith.constant 0 : index
    %c0_7 = arith.constant 0 : index
    %8 = vector.load %arg11[%c0_6, %c0_7] : memref<128x128xf32, #tpu.memory_space<vmem>>, vector<128x128xf32>
    tpu.vector_store %arg11[%c0_6, %c0_7], %7 {strides = array<i32>} : memref<128x128xf32, #tpu.memory_space<vmem>>, vector<128x128xf32>,
    %c1_i32 = arith.constant 1 : i32
    %9 = arith.cmpi eq, %arg1, %c1_i32 : i32
    %10 = arith.extui %9 : i1 to i32
    %c0_i32_8 = arith.constant 0 : i32
    %11 = arith.cmpi ne, %10, %c0_i32_8 : i32
    scf.if %11 {
      %c0_9 = arith.constant 0 : index
      %c0_10 = arith.constant 0 : index
      %12 = vector.load %arg4[%c0_9, %c0_10] : memref<128x128xbf16, #tpu.memory_space<vmem>>, vector<128x128xbf16>
      %c0_11 = arith.constant 0 : index
      %c0_12 = arith.constant 0 : index
      %13 = vector.load %arg11[%c0_11, %c0_12] : memref<128x128xf32, #tpu.memory_space<vmem>>, vector<128x128xf32>
      %14 = arith.truncf %13 : vector<128x128xf32> to vector<128x128xbf16>
      %c0_13 = arith.constant 0 : index
      %c0_14 = arith.constant 0 : index
      %15 = vector.load %arg5[%c0_13, %c0_14] : memref<128x128xbf16, #tpu.memory_space<vmem>>, vector<128x128xbf16>
      %cst_15 = arith.constant dense<0.000000e+00> : vector<128x128xf32>
      %16 = tpu.matmul %12, %15, %cst_15 {dimension_numbers = #tpu.dot_dimension_numbers<[1], [0], [0], [1], [0, 0, 1, 1], [], []>} : vector<128x128xbf16>, vector<128x128xbf16>, vector<128x128xf32> -> vector<128x128xf32>
      %c0_16 = arith.constant 0 : index
      %c0_17 = arith.constant 0 : index
      %17 = vector.load %arg6[%c0_16, %c0_17] : memref<128x128xbf16, #tpu.memory_space<vmem>>, vector<128x128xbf16>
      %cst_18 = arith.constant dense<0.000000e+00> : vector<128x128xf32>
      %18 = tpu.matmul %14, %17, %cst_18 {dimension_numbers = #tpu.dot_dimension_numbers<[1], [0], [0], [1], [0, 0, 1, 1], [], []>} : vector<128x128xbf16>, vector<128x128xbf16>, vector<128x128xf32> -> vector<128x128xf32>
      %19 = arith.addf %16, %18 : vector<128x128xf32>
      %c0_19 = arith.constant 0 : index
      %c0_20 = arith.constant 0 : index
      %20 = vector.load %arg7[%c0_19, %c0_20] : memref<1x128xf32, #tpu.memory_space<vmem>>, vector<1x128xf32>
      %21 = vector.broadcast %20 : vector<1x128xf32> to vector<128x128xf32>
      %22 = arith.addf %19, %21 : vector<128x128xf32>
      %cst_21 = arith.constant 0.000000e+00 : f32
      %23 = vector.broadcast %cst_21 : f32 to vector<128x128xf32>
      %24 = arith.maximumf %22, %23 : vector<128x128xf32>
      %25 = arith.truncf %24 : vector<128x128xf32> to vector<128x128xbf16>
      %c0_22 = arith.constant 0 : index
      %c0_23 = arith.constant 0 : index
      %26 = vector.load %arg8[%c0_22, %c0_23] : memref<128x128xbf16, #tpu.memory_space<vmem>>, vector<128x128xbf16>
      %cst_24 = arith.constant dense<0.000000e+00> : vector<128x128xf32>
      %27 = tpu.matmul %25, %26, %cst_24 {dimension_numbers = #tpu.dot_dimension_numbers<[1], [0], [0], [1], [0, 0, 1, 1], [], []>} : vector<128x128xbf16>, vector<128x128xbf16>, vector<128x128xf32> -> vector<128x128xf32>
      %c0_25 = arith.constant 0 : index
      %c0_26 = arith.constant 0 : index
      %28 = vector.load %arg9[%c0_25, %c0_26] : memref<1x128xf32, #tpu.memory_space<vmem>>, vector<1x128xf32>
      %29 = vector.broadcast %28 : vector<1x128xf32> to vector<128x128xf32>
      %30 = arith.addf %27, %29 : vector<128x128xf32>
      %c0_27 = arith.constant 0 : index
      %c0_28 = arith.constant 0 : index
      %31 = vector.load %arg10[%c0_27, %c0_28] : memref<128x128xf32, #tpu.memory_space<vmem>>, vector<128x128xf32>
      tpu.vector_store %arg10[%c0_27, %c0_28], %30 {strides = array<i32>} : memref<128x128xf32, #tpu.memory_space<vmem>>, vector<128x128xf32>,
    } else {
    }
    return
  }
  func.func @transform_0(%arg0: i32, %arg1: i32) -> (i32, i32) {
    %c0_i32 = arith.constant 0 : i32
    return %arg0, %arg1 : i32, i32
  }
  func.func @transform_1(%arg0: i32, %arg1: i32) -> (i32, i32) {
    %c0_i32 = arith.constant 0 : i32
    %c0_i32_0 = arith.constant 0 : i32
    return %arg1, %c0_i32 : i32, i32
  }
  func.func @transform_2(%arg0: i32, %arg1: i32) -> (i32, i32) {
    %c0_i32 = arith.constant 0 : i32
    %c0_i32_0 = arith.constant 0 : i32
    return %arg0, %c0_i32 : i32, i32
  }
  func.func @transform_3(%arg0: i32, %arg1: i32) -> (i32, i32) {
    %c0_i32 = arith.constant 0 : i32
    %c0_i32_0 = arith.constant 0 : i32
    %c0_i32_1 = arith.constant 0 : i32
    return %c0_i32, %c0_i32_0 : i32, i32
  }
  func.func @transform_4(%arg0: i32, %arg1: i32) -> (i32, i32) {
    %c0_i32 = arith.constant 0 : i32
    %c0_i32_0 = arith.constant 0 : i32
    %c0_i32_1 = arith.constant 0 : i32
    return %c0_i32, %c0_i32_0 : i32, i32
  }
  func.func @transform_5(%arg0: i32, %arg1: i32) -> (i32, i32) {
    %c0_i32 = arith.constant 0 : i32
    %c0_i32_0 = arith.constant 0 : i32
    %c0_i32_1 = arith.constant 0 : i32
    return %c0_i32, %c0_i32_0 : i32, i32
  }
  func.func @transform_6(%arg0: i32, %arg1: i32) -> (i32, i32) {
    %c0_i32 = arith.constant 0 : i32
    %c0_i32_0 = arith.constant 0 : i32
    %c0_i32_1 = arith.constant 0 : i32
    return %c0_i32, %c0_i32_0 : i32, i32
  }
  func.func @transform_7(%arg0: i32, %arg1: i32) -> (i32, i32) {
    %c0_i32 = arith.constant 0 : i32
    %c0_i32_0 = arith.constant 0 : i32
    %c0_i32_1 = arith.constant 0 : i32
    return %c0_i32, %c0_i32_0 : i32, i32
  }
  func.func @transform_8(%arg0: i32, %arg1: i32) -> (i32, i32) {
    %c0_i32 = arith.constant 0 : i32
    %c0_i32_0 = arith.constant 0 : i32
    return %arg0, %c0_i32 : i32, i32
  }
}

</mosaic_0001>

<bundles_post_ra>
// kernel: graphsage_forward.2
= control target key start
LH: loop header
LB: loop body
LE: loop exit
PB: predicated region body
PF: predicated region fallthrough
CT: control target
= control target key end

     0   :  { %s2647_s0 = inlined_call_operand.hbm [shape: bf16[256,256], index: 0, kind: input, shape index: {}]   ;;  %s2648_s1 = inlined_call_operand.hbm [shape: bf16[256,128], index: 1, kind: input, shape index: {}, may-alias: {1,2}]   ;;  %s2649_s2 = inlined_call_operand.hbm [shape: bf16[256,128], index: 2, kind: input, shape index: {}, may-alias: {1,2}]   ;;  %s2650_s3 = inlined_call_operand.hbm [shape: bf16[128,128], index: 3, kind: input, shape index: {}]   ;;  %s2651_s4 = inlined_call_operand.hbm [shape: bf16[128,128], index: 4, kind: input, shape index: {}]   ;;  %s2652_s5 = inlined_call_operand.hbm [shape: f32[1,128], index: 5, kind: input, shape index: {}]   ;;  %s2653_s6 = inlined_call_operand.vmem [shape: bf16[256,128], index: 6, kind: output, shape index: {}]  }
   0x1   :  { %2669 = sst [smem:[#allocation27_spill]] %s2647_s0 }
   0x2   :  { %2670 = sst [smem:[#allocation28_spill]] %s2648_s1 }
   0x3   :  { %2671 = sst [smem:[#allocation29_spill]] %s2649_s2 }
   0x4   :  { %2672 = sst [smem:[#allocation30_spill]] %s2650_s3 }
   0x5   :  { %2673 = sst [smem:[#allocation31_spill]] %s2653_s6 }
   0x6   :  { %11 = vsyncpa [#allocation4], 0 }
   0x7   :  { %13 = vsyncpa [#allocation4 + $0x1], 0 }
   0x8   :  { %14 = vsyncpa [#allocation6], 0 }
   0x9   :  { %16 = vsyncpa [#allocation6 + $0x1], 0 }
   0xa   :  { %17 = vsyncpa [#allocation9], 0 }
   0xb   :  { %18 = vsyncpa [#allocation12], 0  ;;  %s2247_s21 = smov 0   ;;  %s2249_s22 = smov 0  }
   0xc   :  { %s2251_s23 = smov 0   ;;  %s2253_s24 = smov 0  }
   0xd   :  { %s2255_s25 = smov 0   ;;  %s2257_s26 = smov 0  }
   0xe   :  { %s2259_s27 = smov 0   ;;  %s2261_s28 = smov 0  }
   0xf   :  { %s2263_s29 = smov 0   ;;  %s2265_s30 = smov 0  }
  0x10   :  { %s2267_s7 = smov 0   ;;  %s2269_s8 = smov 0  }
  0x11   :  { %s2271_s9 = smov 0   ;;  %s2273_s10 = smov 0  }
  0x12 LB: > { %2674 = sst [smem:[#allocation18_spill]] %s2148_s21  ;;  %s2654_s11 = sadd.s32 4294967295, %s2200_s10   ;;  %s2200_s10 = sphi %s2273_s10, %s24_s10   ;;  %s2196_s9 = sphi %s2271_s9, %s2734_s9   ;;  %s2192_s8 = sphi %s2269_s8, %s2733_s8   ;;  %s2188_s7 = sphi %s2267_s7, %s2732_s7   ;;  %s2184_s30 = sphi %s2265_s30, %s2731_s30   ;;  %s2180_s29 = sphi %s2263_s29, %s2730_s29   ;;  %s2176_s28 = sphi %s2261_s28, %s2729_s28   ;;  %s2172_s27 = sphi %s2259_s27, %s2728_s27   ;;  %s2168_s26 = sphi %s2257_s26, %s2727_s26   ;;  %s2164_s25 = sphi %s2255_s25, %s2726_s25   ;;  %s2160_s24 = sphi %s2253_s24, %s2718_s24   ;;  %s2156_s23 = sphi %s2251_s23, %s2725_s23   ;;  %s2152_s22 = sphi %s2249_s22, %s2724_s22   ;;  %s2148_s21 = sphi %s2247_s21, %s2723_s21  }
  0x13   : > { %2675 = sst [smem:[#allocation19_spill]] %s2164_s25  ;;  %p1393_p0 = scmp.ge.s32.totalorder %s2200_s10, 1 }
  0x14   : > { %2676 = sst [smem:[#allocation20_spill]] %s2184_s30  ;;  %p2321_p1 = scmp.eq.s32.totalorder %s2654_s11, 0 }
  0x15   : > { %2677 = sst [smem:[#allocation21_spill]] %s2188_s7  ;;  %p210_p2 = scmp.lt.s32.totalorder %s2200_s10, 5 }
  0x16   : > { %s2202_s14 = smov [#allocation8]  }
  0x17   : > { %p2326_p3 = pnand %p1393_p0, %p210_p2  ;;  %s222_s15 = sshll.u32 %s2202_s14, 4  ;;  %s223_s15 = int_to_ptr.vmem [resolvable:$true] %s222_s15 }
  0x18   : > { %s1919_s17 = scalar_lea.vmem %s223_s15, 1024  ;;  %p1927_p10 = scmp.lt.s32.totalorder %s223_s15, %s223_s15 }
  0x19   : > { %s2679_s13 = scalar_select %p2326_p3, 1, 0 }
  0x1a   : > { %p1722_p4 = pneg %p2326_p3  ;;  %p1920_p7 = scmp.ne.s32.totalorder %s223_s15, %s1919_s17 }
  0x1b   : > { %2680 = sst [smem:[#allocation22_spill]] %s2679_s13  ;;  %p1928_p11 = scmp.lt.s32.totalorder %s1919_s17, %s1919_s17 }
  0x1c   : > { %p2334_p5 = pnand %p1722_p4, %p2321_p1 }
  0x1d   : > { %p1929_p12 = por %p1928_p11, %p1927_p10 }
  0x1e   : > { %p2667_p6 = pneg %p2334_p5 }
  0x20   : > { %p1922_p8 = pnand %p1920_p7, %p2667_p6 }
  0x22   : > { %p1923_p9 = pneg %p1922_p8 }
  0x24   : > { %p1930_p13 = pnand %p1929_p12, %p1923_p9 }
  0x26   : > { %1933 = shalt.err (!%p1930_p13)
}
  0x27   : > { %s2655_s18 = smov 64   ;;  %s2657_s19 = smov 4  }
  0x28   : > { %s2682_s3 = sld [smem:[#allocation30_spill]]  ;;  %s33_s17 = sadd.s32 1, %s2192_s8 }
  0x29   : > { %p34_p0 = scmp.ge.s32.totalorder %s33_s17, 2  ;;  %s36_s11 = sadd.s32 1, %s2196_s9 }
  0x2a   : > { %p2665_p2 = scmp.eq.s32.totalorder %s2200_s10, 0  ;;  %s71_s30 = sadd.s32 1, %s2168_s26 }
  0x2b   : > { %s2736_s17 = smov (%p34_p0, %s33_s17), 0  ;;  %s2738_s11 = smov (!%p34_p0, %s36_s11), %s2196_s9 }
  0x2c   : > { %2683 = sst [smem:[#allocation23_spill]] %s2736_s17  ;;  %s41_s6 = ssub.s32 %s2192_s8, %s2736_s17 }
  0x2d   : > { %p78_p4 = scmp.ne.s32.totalorder %s2168_s26, %s2164_s25  ;;  %p38_p7 = scmp.ge.s32.totalorder %s2738_s11, 2 }
  0x2e   : > { %1725 = dma.hbm_to_vmem [thread:$0]  (!%p2334_p5), %s2682_s3, 1024, %s223_s15, [#allocation9], %s2655_s18, %s2655_s18, %s2657_s19  }
  0x2f   : > { %p69_p8 = scmp.eq.s32.totalorder %s41_s6, 0  ;;  %p2364_p9 = por %p78_p4, %p2665_p2 }
  0x30   : > { %p84_p10 = scmp.ne.s32.totalorder %s2164_s25, %s2160_s24  ;;  %s2740_s11 = smov (%p38_p7, %s2738_s11), 0 }
  0x31   : > { %2685 = sst [smem:[#allocation24_spill]] %s2740_s11  ;;  %s2377_s14 = ssub.s32 %s2196_s9, %s2740_s11 }
  0x32   : > { %s2373_s20 = scalar_select %p69_p8, %s2168_s26, %s71_s30  }
  0x33   : > { %p2381_p11 = por %p84_p10, %p2321_p1  ;;  %s42_s19 = sor.u32 %s41_s6, %s2377_s14 }
  0x34   : > { %2686 = sst [smem:[#allocation25_spill]] %s2373_s20  ;;  %p2387_p13 = scmp.eq.s32.totalorder %s42_s19, 0 }
  0x35   : > { %s2687_s18 = scalar_select %p2381_p11, 1, 0 }
  0x36   : > { %p2666_p0 = scmp.lt.s32.totalorder %s2200_s10, 4  ;;  %s283_s3 = sand.u32 1, %s2200_s10  }
  0x37   : > { %2688 = sst [smem:[#allocation26_spill]] %s2687_s18  ;;  %s285_s17 = sand.u32 1, %s2168_s26  }
  0x38   : > { %s1402_s30 = sshll.u32 %s285_s17, 6  ;;  %s1479_s20 = sshll.u32 %s2192_s8, 10 }
  0x39   : > { %s2690_s1 = sld [smem:[#allocation28_spill]]  ;;  %s287_s13 = scalar_lea.vmem [#allocation5], %s1402_s30 }
  0x3a   : > { %s294_s2 = sshll.u32 %s287_s13, 4  ;;  %p2402_p4 = pnand %p2666_p0, %p2364_p9  ;;  %s295_s2 = int_to_ptr.vmem [resolvable:$true] %s294_s2 }
  0x3b   : > { %s2205_s19 = smov [#allocation10]   ;;  %s2406_s21 = scalar_lea.sflag [#allocation6], %s283_s3 }
  0x3c   : > { %s235_s18 = sshll.u32 %s2205_s19, 4  ;;  %p1936_p7 = pneg %p2402_p4  ;;  %s236_s18 = int_to_ptr.vmem [resolvable:$true] %s235_s18 }
  0x3d   : > { %s1947_s17 = scalar_lea.vmem %s295_s2, 1024  ;;  %s2206_s7 = smov [#allocation5]  }
  0x3e   : > { %p1948_p8 = scmp.ne.s32.totalorder %s295_s2, %s1947_s17  ;;  %s1952_s11 = sshll.u32 %s2206_s7, 4  ;;  %s1953_s11 = int_to_ptr.vmem [resolvable:$false] %s1952_s11 }
  0x3f   : > { %s293_s25 = scalar_lea.hbm %s2690_s1, %s1479_s20  ;;  %s1954_s13 = scalar_lea.vmem %s1953_s11, 2048 }
  0x40   : > { %p1950_p10 = pnand %p1948_p8, %p1936_p7  ;;  %p1955_p2 = scmp.lt.s32.totalorder %s295_s2, %s1953_s11 }
  0x41   : > { %p1956_p9 = scmp.lt.s32.totalorder %s1954_s13, %s1947_s17 }
  0x42   : > { %p1951_p12 = pneg %p1950_p10 }
  0x43   : > { %p1957_p0 = por %p1956_p9, %p1955_p2 }
  0x45   : > { %p1958_p6 = pnand %p1957_p0, %p1951_p12 }
  0x47   : > { %1961 = shalt.err (!%p1958_p6)
}
  0x48   : > { %s2692_s15 = smov 4   ;;  %s2693_s3 = smov 64  }
  0x49   : > { %1738 = dma.hbm_to_vmem [thread:$0]  (!%p2402_p4), %s293_s25, 1024, %s295_s2, %s2406_s21, %s2693_s3, %s2693_s3, %s2692_s15  }
  0x4a   : > { %s2207_s20 = smov [#allocation11]   ;;  %s1973_s19 = scalar_lea.vmem %s236_s18, 1024 }
  0x4b   : > { %s249_s30 = sshll.u32 %s2207_s20, 4  ;;  %p1974_p7 = scmp.ne.s32.totalorder %s236_s18, %s1973_s19  ;;  %s250_s30 = int_to_ptr.vmem [resolvable:$true] %s249_s30 }
  0x4c   : > { %p2694_p8 = pneg %p2334_p5  ;;  %p1981_p2 = scmp.lt.s32.totalorder %s236_s18, %s236_s18 }
  0x4d   : > { %p1982_p12 = scmp.lt.s32.totalorder %s1973_s19, %s1973_s19 }
  0x4e   : > { %p1976_p10 = pnand %p1974_p7, %p2694_p8 }
  0x4f   : > { %p1983_p6 = por %p1982_p12, %p1981_p2 }
  0x50   : > { %p1977_p11 = pneg %p1976_p10 }
  0x52   : > { %p1984_p0 = pnand %p1983_p6, %p1977_p11 }
  0x54   : > { %1987 = shalt.err (!%p1984_p0)
}
  0x55   : > { %1728 = dma.hbm_to_vmem [thread:$0]  (!%p2334_p5), %s2651_s4, 1024, %s236_s18, [#allocation9], %s2693_s3, %s2693_s3, %s2692_s15  }
  0x56   : > { %s1999_s6 = scalar_lea.vmem %s250_s30, 16  ;;  %p2695_p9 = pmov %p2694_p8 }
  0x57   : > { %p2000_p4 = scmp.ne.s32.totalorder %s250_s30, %s1999_s6  ;;  %s2006_s17 = scalar_lea.vmem %s250_s30, 32 }
  0x58   : > { %p2007_p11 = scmp.lt.s32.totalorder %s250_s30, %s250_s30  ;;  %p2008_p10 = scmp.lt.s32.totalorder %s2006_s17, %s1999_s6 }
  0x59   : > { %p2002_p7 = pnand %p2000_p4, %p2695_p9 }
  0x5a   : > { %p2009_p2 = por %p2008_p10, %p2007_p11 }
  0x5b   : > { %p2003_p8 = pneg %p2002_p7 }
  0x5d   : > { %p2010_p12 = pnand %p2009_p2, %p2003_p8 }
  0x5f   : > { %2013 = shalt.err (!%p2010_p12)
}
  0x60   : > { %1731 = dma.hbm_to_vmem [thread:$0]  (!%p2334_p5), %s2652_s5, 16, %s250_s30, [#allocation12]  }
  0x61   : > { %s45_s18 = sadd.s32 1, %s2180_s29  ;;  %p52_p6 = scmp.ne.s32.totalorder %s2180_s29, %s2176_s28 }
  0x62   : > { %s2439_s16 = scalar_select %p2387_p13, %s2180_s29, %s45_s18  }
  0x63   : > { %p58_p0 = scmp.ne.s32.totalorder %s2176_s28, %s2172_s27  ;;  %s260_s13 = sand.u32 1, %s2180_s29  }
  0x64   : > { %s1478_s20 = sshll.u32 %s2196_s9, 5  ;;  %p2696_p4 = scmp.eq.s32.totalorder %s2200_s10, 0 }
  0x65   : > { %p2451_p7 = por %p2321_p1, %p58_p0  ;;  %s1398_s2 = sshll.u32 %s260_s13, 6 }
  0x66   : > { %p54_p9 = por %p2696_p4, %p52_p6  ;;  %s270_s25 = sadd.s32 %s2192_s8, %s1478_s20 }
  0x67   : > { %s1401_s6 = sshll.u32 %s270_s25, 6  ;;  %s264_s30 = scalar_lea.vmem [#allocation3], %s1398_s2 }
  0x68   : > { %s273_s17 = sshll.u32 %s264_s30, 4  ;;  %s2698_s0 = sld [smem:[#allocation27_spill]]  ;;  %s274_s17 = int_to_ptr.vmem [resolvable:$true] %s273_s17 }
  0x69   : > { %p2699_p5 = scmp.lt.s32.totalorder %s2200_s10, 4  ;;  %s261_s18 = scalar_lea.sflag [#allocation4], %s260_s13 }
  0x6a   : > { %s2027_s1 = scalar_lea.vmem %s274_s17, 1024  ;;  %s2208_s20 = smov [#allocation3]  }
  0x6b   : > { %p2461_p13 = pnand %p2699_p5, %p54_p9  ;;  %p2028_p11 = scmp.ne.s32.totalorder %s274_s17, %s2027_s1 }
  0x6c   : > { %s2032_s2 = sshll.u32 %s2208_s20, 4  ;;  %s2033_s2 = int_to_ptr.vmem [resolvable:$false] %s2032_s2 }
  0x6d   : > { %p2016_p8 = pneg %p2461_p13  ;;  %s2034_s25 = scalar_lea.vmem %s2033_s2, 2048 }
  0x6e   : > { %s272_s11 = scalar_lea.hbm %s2698_s0, %s1401_s6  ;;  %p2035_p12 = scmp.lt.s32.totalorder %s274_s17, %s2033_s2 }
  0x6f   : > { %p2030_p10 = pnand %p2028_p11, %p2016_p8  ;;  %p2036_p6 = scmp.lt.s32.totalorder %s2034_s25, %s2027_s1 }
  0x71   : > { %p2031_p2 = pneg %p2030_p10  ;;  %p2037_p0 = por %p2036_p6, %p2035_p12 }
  0x73   : > { %p2038_p4 = pnand %p2037_p0, %p2031_p2 }
  0x75   : > { %2041 = shalt.err (!%p2038_p4)
}
  0x76   : > { %s2209_s6 = smov 128   ;;  %s2701_s13 = sld [smem:[#allocation18_spill]] }
  0x77   : > { %1735 = dma.hbm_to_vmem [thread:$0]  (!%p2461_p13), %s272_s11, 1024, %s274_s17, %s261_s18, %s2209_s6, %s2693_s3, %s2692_s15  }
  0x78   : > { %s97_s1 = sadd.s32 1, %s2156_s23  ;;  %p2702_p9 = scmp.eq.s32.totalorder %s2377_s14, 0 }
  0x79   : > { %p104_p5 = scmp.ne.s32.totalorder %s2156_s23, %s2152_s22  ;;  %s306_s7 = sand.u32 1, %s2156_s23  }
  0x7a   : > { %s2475_s30 = scalar_select %p2702_p9, %s2156_s23, %s97_s1  }
  0x7b   : > { %s1480_s24 = sshll.u32 %s2196_s9, 10  ;;  %p2703_p11 = scmp.eq.s32.totalorder %s2200_s10, 0 }
  0x7c   : > { %p110_p8 = scmp.ne.s32.totalorder %s2152_s22, %s2701_s13  ;;  %s1405_s20 = sshll.u32 %s306_s7, 6 }
  0x7d   : > { %p106_p10 = por %p104_p5, %p2703_p11  ;;  %s2705_s0 = sld [smem:[#allocation29_spill]] }
  0x7e   : > { %p2487_p2 = por %p110_p8, %p2321_p1  ;;  %p2706_p13 = scmp.lt.s32.totalorder %s2200_s10, 4 }
  0x7f   : > { %s308_s11 = scalar_lea.vmem [#allocation7], %s1405_s20  ;;  %s2210_s13 = smov [#allocation7]  }
  0x80   : > { %p2496_p12 = pnand %p2706_p13, %p106_p10  ;;  %s315_s18 = sshll.u32 %s308_s11, 4  ;;  %s316_s18 = int_to_ptr.vmem [resolvable:$true] %s315_s18 }
  0x81   : > { %s2055_s6 = scalar_lea.vmem %s316_s18, 1024  ;;  %s2060_s1 = sshll.u32 %s2210_s13, 4  ;;  %s2061_s1 = int_to_ptr.vmem [resolvable:$false] %s2060_s1 }
  0x82   : > { %p2044_p6 = pneg %p2496_p12  ;;  %p2056_p0 = scmp.ne.s32.totalorder %s316_s18, %s2055_s6 }
  0x83   : > { %s314_s17 = scalar_lea.hbm %s2705_s0, %s1480_s24  ;;  %s2062_s7 = scalar_lea.vmem %s2061_s1, 2048 }
  0x84   : > { %p2058_p4 = pnand %p2056_p0, %p2044_p6  ;;  %p2063_p5 = scmp.lt.s32.totalorder %s316_s18, %s2061_s1 }
  0x85   : > { %p2064_p8 = scmp.lt.s32.totalorder %s2062_s7, %s2055_s6 }
  0x86   : > { %p2059_p9 = pneg %p2058_p4 }
  0x87   : > { %p2065_p11 = por %p2064_p8, %p2063_p5 }
  0x89   : > { %p2066_p10 = pnand %p2065_p11, %p2059_p9 }
  0x8b   : > { %2069 = shalt.err (!%p2066_p10)
}
  0x8c   : > { %1741 = dma.hbm_to_vmem [thread:$0]  (!%p2496_p12), %s314_s17, 1024, %s316_s18, %s2406_s21, %s2693_s3, %s2693_s3, %s2692_s15  }
  0x8d   : > { %327 = sbr.rel (%p2326_p3) target bundleno = 698 (0x2ba), region = 44  ;;  %s329_s24 = sand.u32 (!%p2326_p3), 1, %s2176_s28  }
  0x8e   : > { %s1409_s20 = sshll.u32 (!%p2326_p3), %s329_s24, 6  ;;  %s330_s2 = scalar_lea.sflag (!%p2326_p3), [#allocation4], %s329_s24 }
  0x8f   : > { %s2511_s25 = scalar_lea.vmem (!%p2326_p3), [#allocation3], %s1409_s20 }
  0x92   : > { %2127 = dma.done.wait (%p2451_p7), %s330_s2, 1024  }
  0x93   : > { %2129 = vsyncadd (%p2451_p7), %s330_s2, 4294966272  ;;  %s2709_s14 = sadd.s32 4294967295, %s2200_s10   ;;  %s2710_s11 = sld [smem:[#allocation19_spill]] }
  0x94   : > { %s2711_s6 = sld [smem:[#allocation26_spill]]  ;;  %s338_s21 = sand.u32 1, %s2709_s14  }
  0x95   : > { %s339_s17 = scalar_lea.sflag [#allocation6], %s338_s21 }
  0x99   : > { %s340_s15 = sand.u32 1, %s2710_s11  }
  0x9a   : > { %s1410_s3 = sshll.u32 %s340_s15, 6  ;;  %p2712_p3 = scmp.ne.s32.totalorder %s2711_s6, 0 }
  0x9b   : > { %s2520_s18 = scalar_lea.vmem [#allocation5], %s1410_s3 }
  0x9c   : > { %2131 = dma.done.wait (%p2712_p3), %s339_s17, 1024  }
  0x9d   : > { %2133 = vsyncadd (%p2712_p3), %s339_s17, 4294966272  ;;  %s349_s13 = sand.u32 1, %s2152_s22  }
  0x9e   : > { %s1411_s19 = sshll.u32 %s349_s13, 6 }
  0x9f   : > { %s2527_s1 = scalar_lea.vmem [#allocation7], %s1411_s19 }
  0xa0   : > { %2135 = dma.done.wait (%p2487_p2), %s339_s17, 1024  }
  0xa1   : > { %2137 = vsyncadd (%p2487_p2), %s339_s17, 4294966272 }
  0xa2   : > { %2139 = dma.done.wait (%p2321_p1), [#allocation9], 2048  }
  0xa3   : > { %2141 = vsyncadd (%p2321_p1), [#allocation9], 4294965248 }
  0xa4   : > { %2143 = dma.done.wait (%p2321_p1), [#allocation12], 16  }
  0xa5   : > { %2145 = vsyncadd (%p2321_p1), [#allocation12], 4294967280  ;;  %s2713_s7 = sld [smem:[#allocation21_spill]] }
  0xa6   : > { %s2714_s2 = sld [smem:[#allocation31_spill]] }
  0xa7   : > { %s2715_s11 = sld [smem:[#allocation20_spill]] }
  0xab   : > { %s1415_s0 = sshll.u32 %s2713_s7, 4 }
  0xac   : > { %p406_p7 = scmp.lt.s32.totalorder %s1415_s0, 31 }
  0xad   : > { %p1417_p2 = scmp.ne.s32.totalorder %s2715_s11, 0 }
  0xae   : > { %s2742_s0 = smov (!%p406_p7, %s1415_s0), 31 }
  0xaf   : > { %s1416_s24 = sshll.u32 %s2742_s0, 2  ;;  %415 = sbr.rel (%p1417_p2) target bundleno = 189 (0xbd), region = 72 }
  0xb0   : > { %s2545_s14 = scalar_lea.vmem %s2714_s2, %s1416_s24 }
  0xb4   : > { %v2211_v0 = vmov 0.0  }
  0xb5   : > { %416 = vst [vmem:[#allocation2 + $0x30] sm:$0xff] %v2211_v0  ;;  %417 = vst [vmem:[#allocation2] sm:$0xff] %v2211_v0 }
  0xb6   : > { %418 = vst [vmem:[#allocation2 + $0x58] sm:$0xff] %v2211_v0  ;;  %419 = vst [vmem:[#allocation2 + $0x18] sm:$0xff] %v2211_v0 }
  0xb7   : > { %420 = vst [vmem:[#allocation2 + $0x50] sm:$0xff] %v2211_v0  ;;  %421 = vst [vmem:[#allocation2 + $0x68] sm:$0xff] %v2211_v0 }
  0xb8   : > { %422 = vst [vmem:[#allocation2 + $0x8] sm:$0xff] %v2211_v0  ;;  %423 = vst [vmem:[#allocation2 + $0x48] sm:$0xff] %v2211_v0 }
  0xb9   : > { %424 = vst [vmem:[#allocation2 + $0x40] sm:$0xff] %v2211_v0  ;;  %425 = vst [vmem:[#allocation2 + $0x20] sm:$0xff] %v2211_v0 }
  0xba   : > { %426 = vst [vmem:[#allocation2 + $0x10] sm:$0xff] %v2211_v0  ;;  %427 = vst [vmem:[#allocation2 + $0x38] sm:$0xff] %v2211_v0 }
  0xbb   : > { %428 = vst [vmem:[#allocation2 + $0x60] sm:$0xff] %v2211_v0  ;;  %429 = vst [vmem:[#allocation2 + $0x70] sm:$0xff] %v2211_v0 }
  0xbc   : > { %430 = vst [vmem:[#allocation2 + $0x78] sm:$0xff] %v2211_v0  ;;  %431 = vst [vmem:[#allocation2 + $0x28] sm:$0xff] %v2211_v0 }
  0xbd PF: > { %v1868_v1 = vld [vmem:[%s2520_s18 + $0x38] sm:$0xff]   ;;  %v1869_v2 = vld [vmem:[%s2520_s18 + $0x30] sm:$0xff]   ;;  %v1870_v3 = vld [vmem:[%s2520_s18 + $0x28] sm:$0xff]   ;;  %s2716_s12 = sld [smem:[#allocation20_spill]] }
  0xbe   : > { %1592 = vmatprep.subr.bf16.mxu0 %v1868_v1  ;;  %1688 = vmatprep.subr.bf16.mxu1 %v1868_v1  ;;  %v1871_v4 = vld [vmem:[%s2520_s18 + $0x20] sm:$0xff]   ;;  %v1872_v7 = vld [vmem:[%s2520_s18 + $0x18] sm:$0xff]   ;;  %v1873_v8 = vld [vmem:[%s2520_s18 + $0x10] sm:$0xff]  }
  0xbf   : > { %1593 = vmatpush3.bf16.msra.mxu0 %v1868_v1  ;;  %1696 = vmatpush3.bf16.msra.mxu1 %v1868_v1  ;;  %v1876_v5 = vld [vmem:[%s2511_s25] sm:$0xff]   ;;  %v1874_v9 = vld [vmem:[%s2520_s18 + $0x8] sm:$0xff]   ;;  %v1880_v13 = vld [vmem:[%s2511_s25 + $0x10] sm:$0xff]  }
  0xc0   : > { %1594 = vmatprep.subr.bf16.mxu0 %v1869_v2  ;;  %1689 = vmatprep.subr.bf16.mxu1 %v1869_v2  ;;  %v1877_v6 = vld [vmem:[%s2511_s25 + $0x20] sm:$0xff]   ;;  %v1878_v11 = vld [vmem:[%s2511_s25 + $0x8] sm:$0xff]   ;;  %v1881_v14 = vld [vmem:[%s2511_s25 + $0x30] sm:$0xff]  }
  0xc1   : > { %1608 = vmatprep.mubr.bf16.mxu0 %v1876_v5  ;;  %1616 = vmatprep.mubr.bf16.mxu1 %v1877_v6  ;;  %v1875_v10 = vld [vmem:[%s2520_s18] sm:$0xff]   ;;  %v1879_v12 = vld [vmem:[%s2511_s25 + $0x28] sm:$0xff]   ;;  %v1882_v15 = vld [vmem:[%s2511_s25 + $0x18] sm:$0xff]  }
  0xc2   : > { %v1883_v16 = vld [vmem:[%s2511_s25 + $0x38] sm:$0xff]   ;;  %v442_v18 = vld [vmem:[#allocation2 + $0x10] sm:$0xff]  ;;  %v440_v22 = vld [vmem:[#allocation2 + $0x40] sm:$0xff] }
  0xc3   : > { %1595 = vmatpush3.bf16.msra.mxu0 %v1869_v2  ;;  %1697 = vmatpush3.bf16.msra.mxu1 %v1869_v2  ;;  %v434_v17 = vld [vmem:[#allocation2 + $0x58] sm:$0xff]  ;;  %v432_v21 = vld [vmem:[#allocation2 + $0x30] sm:$0xff]  ;;  %v433_v33 = vld [vmem:[#allocation2] sm:$0xff]  ;;  %p1434_p1 = scmp.ne.s32.totalorder %s2716_s12, 1 }
  0xc4   : > { %1596 = vmatprep.subr.bf16.mxu0 %v1870_v3  ;;  %1690 = vmatprep.subr.bf16.mxu1 %v1870_v3  ;;  %v435_v27 = vld [vmem:[#allocation2 + $0x18] sm:$0xff]  ;;  %v441_v34 = vld [vmem:[#allocation2 + $0x20] sm:$0xff]  ;;  %v438_v39 = vld [vmem:[#allocation2 + $0x8] sm:$0xff] }
  0xc5   : > { %v443_v28 = vld [vmem:[#allocation2 + $0x38] sm:$0xff]  ;;  %v436_v45 = vld [vmem:[#allocation2 + $0x50] sm:$0xff]  ;;  %v444_v46 = vld [vmem:[#allocation2 + $0x60] sm:$0xff] }
  0xc6   : > { %v446_v40 = vld [vmem:[#allocation2 + $0x78] sm:$0xff]  ;;  %v439_v51 = vld [vmem:[#allocation2 + $0x48] sm:$0xff]  ;;  %v445_v58 = vld [vmem:[#allocation2 + $0x70] sm:$0xff] }
  0xc7   : > { %1597 = vmatpush3.bf16.msra.mxu0 %v1870_v3  ;;  %1698 = vmatpush3.bf16.msra.mxu1 %v1870_v3  ;;  %v447_v52 = vld [vmem:[#allocation2 + $0x28] sm:$0xff] }
  0xc8   : > { %1598 = vmatprep.subr.bf16.mxu0 %v1871_v4  ;;  %1691 = vmatprep.subr.bf16.mxu1 %v1871_v4  ;;  %v437_v57 = vld [vmem:[#allocation2 + $0x68] sm:$0xff] }
  0xcb   : > { %1599 = vmatpush3.bf16.msra.mxu0 %v1871_v4  ;;  %1699 = vmatpush3.bf16.msra.mxu1 %v1871_v4 }
  0xcc   : > { %1600 = vmatprep.subr.bf16.mxu0 %v1872_v7  ;;  %1692 = vmatprep.subr.bf16.mxu1 %v1872_v7 }
  0xcf   : > { %1601 = vmatpush3.bf16.msra.mxu0 %v1872_v7  ;;  %1700 = vmatpush3.bf16.msra.mxu1 %v1872_v7 }
  0xd0   : > { %1602 = vmatprep.subr.bf16.mxu0 %v1873_v8  ;;  %1693 = vmatprep.subr.bf16.mxu1 %v1873_v8 }
  0xd3   : > { %1603 = vmatpush3.bf16.msra.mxu0 %v1873_v8  ;;  %1701 = vmatpush3.bf16.msra.mxu1 %v1873_v8 }
  0xd4   : > { %1604 = vmatprep.subr.bf16.mxu0 %v1874_v9  ;;  %1694 = vmatprep.subr.bf16.mxu1 %v1874_v9 }
  0xd7   : > { %1605 = vmatpush3.bf16.msra.mxu0 %v1874_v9  ;;  %1702 = vmatpush3.bf16.msra.mxu1 %v1874_v9 }
  0xd8   : > { %1606 = vmatprep.subr.bf16.mxu0 %v1875_v10  ;;  %1695 = vmatprep.subr.bf16.mxu1 %v1875_v10 }
  0xdb   : > { %1607 = vmatpush3.bf16.msra.mxu0 %v1875_v10  ;;  %1703 = vmatpush3.bf16.msra.mxu1 %v1875_v10 }
  0xde   : > { %1609 = vmatmul.mubr.bf16.vlgmr.msra.gmra.mxu0 %v1878_v11  ;;  %1617 = vmatmul.mubr.bf16.vlgmr.msra.gmra.mxu1 %v1879_v12 }
  0xdf   : > { %1612 = vmatprep.mubr.bf16.mxu0 %v1880_v13  ;;  %1620 = vmatprep.mubr.bf16.mxu1 %v1881_v14 }
  0xe6   : > { %1613 = vmatmul.mubr.bf16.gmra.mxu0 %v1882_v15  ;;  %1621 = vmatmul.mubr.bf16.gmra.mxu1 %v1883_v16 }
 0x19e   : > { %v1610_v19 = vpop.f32.mrf.mxu0  ;;  %v1618_v20 = vpop.f32.mrf.mxu1 }
 0x19f   : > { %v675_v23 = vadd.f32 %v1610_v19, %v434_v17  ;;  %v683_v24 = vadd.f32 %v1618_v20, %v442_v18 }
 0x1a0   : > { %v610_v25 = vpop.f32.mrf.mxu0  ;;  %v642_v26 = vpop.f32.mrf.mxu1 }
 0x1a1   : > { %691 = vst [vmem:[#allocation2 + $0x58] sm:$0xff] %v675_v23  ;;  %699 = vst [vmem:[#allocation2 + $0x10] sm:$0xff] %v683_v24  ;;  %v673_v29 = vadd.f32 %v610_v25, %v432_v21  ;;  %v681_v30 = vadd.f32 %v642_v26, %v440_v22 }
 0x1a2   : > { %v1611_v31 = vpop.f32.mrf.mxu0  ;;  %v1619_v32 = vpop.f32.mrf.mxu1 }
 0x1a3   : > { %689 = vst [vmem:[#allocation2 + $0x30] sm:$0xff] %v673_v29  ;;  %697 = vst [vmem:[#allocation2 + $0x40] sm:$0xff] %v681_v30  ;;  %v676_v35 = vadd.f32 %v1611_v31, %v435_v27  ;;  %v684_v36 = vadd.f32 %v1619_v32, %v443_v28 }
 0x1a4   : > { %v613_v37 = vpop.f32.mrf.mxu0  ;;  %v645_v38 = vpop.f32.mrf.mxu1 }
 0x1a5   : > { %692 = vst [vmem:[#allocation2 + $0x18] sm:$0xff] %v676_v35  ;;  %700 = vst [vmem:[#allocation2 + $0x38] sm:$0xff] %v684_v36  ;;  %v674_v41 = vadd.f32 %v613_v37, %v433_v33  ;;  %v682_v42 = vadd.f32 %v645_v38, %v441_v34 }
 0x1a6   : > { %v1614_v43 = vpop.f32.mrf.mxu0  ;;  %v1622_v44 = vpop.f32.mrf.mxu1 }
 0x1a7   : > { %690 = vst [vmem:[#allocation2] sm:$0xff] %v674_v41  ;;  %698 = vst [vmem:[#allocation2 + $0x20] sm:$0xff] %v682_v42  ;;  %v679_v47 = vadd.f32 %v1614_v43, %v438_v39  ;;  %v687_v48 = vadd.f32 %v1622_v44, %v446_v40 }
 0x1a8   : > { %v626_v49 = vpop.f32.mrf.mxu0  ;;  %v658_v50 = vpop.f32.mrf.mxu1 }
 0x1a9   : > { %695 = vst [vmem:[#allocation2 + $0x8] sm:$0xff] %v679_v47  ;;  %703 = vst [vmem:[#allocation2 + $0x78] sm:$0xff] %v687_v48  ;;  %v677_v53 = vadd.f32 %v626_v49, %v436_v45  ;;  %v685_v54 = vadd.f32 %v658_v50, %v444_v46 }
 0x1aa   : > { %v1615_v55 = vpop.f32.mrf.mxu0  ;;  %v1623_v56 = vpop.f32.mrf.mxu1 }
 0x1ab   : > { %693 = vst [vmem:[#allocation2 + $0x50] sm:$0xff] %v677_v53  ;;  %701 = vst [vmem:[#allocation2 + $0x60] sm:$0xff] %v685_v54  ;;  %v680_v59 = vadd.f32 %v1615_v55, %v439_v51  ;;  %v688_v60 = vadd.f32 %v1623_v56, %v447_v52  ;;  %708 = sbr.rel (%p1434_p1) target bundleno = 698 (0x2ba), region = 76 }
 0x1ac   : > { %v629_v61 = vpop.f32.mrf.mxu0  ;;  %v661_v62 = vpop.f32.mrf.mxu1 }
 0x1ad   : > { %696 = vst [vmem:[#allocation2 + $0x48] sm:$0xff] %v680_v59  ;;  %704 = vst [vmem:[#allocation2 + $0x28] sm:$0xff] %v688_v60  ;;  %v678_v63 = vadd.f32 %v629_v61, %v437_v57  ;;  %v686_v0 = vadd.f32 %v661_v62, %v445_v58 }
 0x1af   : > { %694 = vst [vmem:[#allocation2 + $0x68] sm:$0xff] %v678_v63  ;;  %702 = vst [vmem:[#allocation2 + $0x70] sm:$0xff] %v686_v0 }
 0x1b0   : > { %v1884_v1 = vld [vmem:[#allocation10 + $0x38] sm:$0xff]   ;;  %v1886_v3 = vld [vmem:[#allocation10 + $0x30] sm:$0xff]   ;;  %v1888_v5 = vld [vmem:[#allocation10 + $0x28] sm:$0xff]  }
 0x1b1   : > { %v1885_v2 = vld [vmem:[#allocation8 + $0x38] sm:$0xff]   ;;  %1624 = vmatprep.subr.bf16.mxu0 %v1884_v1  ;;  %v1887_v4 = vld [vmem:[#allocation8 + $0x30] sm:$0xff]   ;;  %v1889_v6 = vld [vmem:[#allocation8 + $0x28] sm:$0xff]  }
 0x1b2   : > { %1656 = vmatprep.subr.bf16.mxu1 %v1885_v2  ;;  %1625 = vmatpush3.bf16.msra.mxu0 %v1884_v1  ;;  %v1890_v7 = vld [vmem:[#allocation10 + $0x20] sm:$0xff]   ;;  %v1892_v9 = vld [vmem:[#allocation10 + $0x18] sm:$0xff]   ;;  %v1894_v11 = vld [vmem:[#allocation10 + $0x10] sm:$0xff]  }
 0x1b3   : > { %1657 = vmatpush3.bf16.msra.mxu1 %v1885_v2  ;;  %1626 = vmatprep.subr.bf16.mxu0 %v1886_v3  ;;  %v1891_v8 = vld [vmem:[#allocation8 + $0x20] sm:$0xff]   ;;  %v1893_v10 = vld [vmem:[#allocation8 + $0x18] sm:$0xff]   ;;  %v725_v12 = vld [vmem:[#allocation2 + $0x30] sm:$0xff] }
 0x1b4   : > { %1658 = vmatprep.subr.bf16.mxu1 %v1887_v4  ;;  %v726_v13 = vld [vmem:[#allocation2] sm:$0xff]  ;;  %v1895_v14 = vld [vmem:[#allocation8 + $0x10] sm:$0xff]   ;;  %v1896_v17 = vld [vmem:[#allocation10 + $0x8] sm:$0xff]  }
 0x1b5   : > { %v741_v15 = vpack.c.bf16 %v726_v13, %v725_v12  ;;  %v1900_v16 = vld [vmem:[%s2527_s1] sm:$0xff]   ;;  %v1897_v18 = vld [vmem:[#allocation8 + $0x8] sm:$0xff]   ;;  %v727_v21 = vld [vmem:[#allocation2 + $0x58] sm:$0xff] }
 0x1b6   : > { %1627 = vmatpush3.bf16.msra.mxu0 %v1886_v3  ;;  %1672 = vmatprep.mubr.bf16.mxu1 %v1900_v16  ;;  %v1898_v19 = vld [vmem:[#allocation10] sm:$0xff]   ;;  %v728_v22 = vld [vmem:[#allocation2 + $0x18] sm:$0xff]  ;;  %v729_v23 = vld [vmem:[#allocation2 + $0x50] sm:$0xff] }
 0x1b7   : > { %1659 = vmatpush3.bf16.msra.mxu1 %v1887_v4  ;;  %1628 = vmatprep.subr.bf16.mxu0 %v1888_v5  ;;  %v1899_v20 = vld [vmem:[#allocation8] sm:$0xff]   ;;  %v730_v24 = vld [vmem:[#allocation2 + $0x68] sm:$0xff]  ;;  %v742_v25 = vpack.c.bf16 %v728_v22, %v727_v21  ;;  %v1902_v28 = vld [vmem:[%s2527_s1 + $0x10] sm:$0xff]  }
 0x1b8   : > { %1660 = vmatprep.subr.bf16.mxu1 %v1889_v6  ;;  %1640 = vmatprep.mubr.bf16.mxu0 %v741_v15  ;;  %v1901_v26 = vld [vmem:[%s2527_s1 + $0x8] sm:$0xff]   ;;  %v743_v27 = vpack.c.bf16 %v730_v24, %v729_v23  ;;  %v733_v31 = vld [vmem:[#allocation2 + $0x40] sm:$0xff]  ;;  %v1903_v34 = vld [vmem:[%s2527_s1 + $0x18] sm:$0xff]  }
 0x1b9   : > { %v731_v29 = vld [vmem:[#allocation2 + $0x8] sm:$0xff]  ;;  %v734_v32 = vld [vmem:[#allocation2 + $0x20] sm:$0xff]  ;;  %v735_v37 = vld [vmem:[#allocation2 + $0x10] sm:$0xff] }
 0x1ba   : > { %1629 = vmatpush3.bf16.msra.mxu0 %v1888_v5  ;;  %v732_v30 = vld [vmem:[#allocation2 + $0x48] sm:$0xff]  ;;  %v745_v35 = vpack.c.bf16 %v734_v32, %v733_v31  ;;  %v1904_v36 = vld [vmem:[%s2527_s1 + $0x20] sm:$0xff]   ;;  %v736_v38 = vld [vmem:[#allocation2 + $0x38] sm:$0xff] }
 0x1bb   : > { %1661 = vmatpush3.bf16.msra.mxu1 %v1889_v6  ;;  %1630 = vmatprep.subr.bf16.mxu0 %v1890_v7  ;;  %v744_v33 = vpack.c.bf16 %v732_v30, %v731_v29  ;;  %v737_v39 = vld [vmem:[#allocation2 + $0x60] sm:$0xff]  ;;  %v738_v40 = vld [vmem:[#allocation2 + $0x70] sm:$0xff]  ;;  %v746_v41 = vpack.c.bf16 %v736_v38, %v735_v37  ;;  %v1905_v42 = vld [vmem:[%s2527_s1 + $0x28] sm:$0xff]  }
 0x1bc   : > { %1662 = vmatprep.subr.bf16.mxu1 %v1891_v8  ;;  %v747_v43 = vpack.c.bf16 %v738_v40, %v737_v39  ;;  %v1906_v44 = vld [vmem:[%s2527_s1 + $0x30] sm:$0xff]   ;;  %v739_v45 = vld [vmem:[#allocation2 + $0x78] sm:$0xff]  ;;  %v740_v46 = vld [vmem:[#allocation2 + $0x28] sm:$0xff] }
 0x1bd   : > { %v748_v47 = vpack.c.bf16 %v740_v46, %v739_v45  ;;  %v1907_v48 = vld [vmem:[%s2527_s1 + $0x38] sm:$0xff]   ;;  %v2573_v53 = vld [vmem:[#allocation11] ss:$0 sm:$0xff] }
 0x1be   : > { %1631 = vmatpush3.bf16.msra.mxu0 %v1890_v7 }
 0x1bf   : > { %1663 = vmatpush3.bf16.msra.mxu1 %v1891_v8  ;;  %1632 = vmatprep.subr.bf16.mxu0 %v1892_v9 }
 0x1c0   : > { %1664 = vmatprep.subr.bf16.mxu1 %v1893_v10 }
 0x1c2   : > { %1633 = vmatpush3.bf16.msra.mxu0 %v1892_v9 }
 0x1c3   : > { %1665 = vmatpush3.bf16.msra.mxu1 %v1893_v10  ;;  %1634 = vmatprep.subr.bf16.mxu0 %v1894_v11 }
 0x1c4   : > { %1666 = vmatprep.subr.bf16.mxu1 %v1895_v14 }
 0x1c6   : > { %1635 = vmatpush3.bf16.msra.mxu0 %v1894_v11 }
 0x1c7   : > { %1667 = vmatpush3.bf16.msra.mxu1 %v1895_v14  ;;  %1636 = vmatprep.subr.bf16.mxu0 %v1896_v17 }
 0x1c8   : > { %1668 = vmatprep.subr.bf16.mxu1 %v1897_v18 }
 0x1ca   : > { %1637 = vmatpush3.bf16.msra.mxu0 %v1896_v17 }
 0x1cb   : > { %1669 = vmatpush3.bf16.msra.mxu1 %v1897_v18  ;;  %1638 = vmatprep.subr.bf16.mxu0 %v1898_v19 }
 0x1cc   : > { %1670 = vmatprep.subr.bf16.mxu1 %v1899_v20 }
 0x1ce   : > { %1639 = vmatpush3.bf16.msra.mxu0 %v1898_v19 }
 0x1cf   : > { %1671 = vmatpush3.bf16.msra.mxu1 %v1899_v20 }
 0x1d1   : > { %1641 = vmatmul.mubr.bf16.vlgmr.msra.gmra.mxu0 %v742_v25 }
 0x1d2   : > { %1673 = vmatmul.mubr.bf16.vlgmr.msra.gmra.mxu1 %v1901_v26  ;;  %1644 = vmatprep.mubr.bf16.mxu0 %v743_v27 }
 0x1d3   : > { %1676 = vmatprep.mubr.bf16.mxu1 %v1902_v28 }
 0x1d9   : > { %1645 = vmatmul.mubr.bf16.gmra.mxu0 %v744_v33 }
 0x1da   : > { %1677 = vmatmul.mubr.bf16.gmra.mxu1 %v1903_v34  ;;  %1648 = vmatprep.mubr.bf16.mxu0 %v745_v35 }
 0x1db   : > { %1680 = vmatprep.mubr.bf16.mxu1 %v1904_v36 }
 0x1e1   : > { %1649 = vmatmul.mubr.bf16.gmra.mxu0 %v746_v41 }
 0x1e2   : > { %1681 = vmatmul.mubr.bf16.gmra.mxu1 %v1905_v42  ;;  %1652 = vmatprep.mubr.bf16.mxu0 %v747_v43 }
 0x1e3   : > { %1684 = vmatprep.mubr.bf16.mxu1 %v1906_v44 }
 0x1e9   : > { %1653 = vmatmul.mubr.bf16.gmra.mxu0 %v748_v47 }
 0x1ea   : > { %1685 = vmatmul.mubr.bf16.gmra.mxu1 %v1907_v48 }
 0x291   : > { %v1642_v49 = vpop.f32.mrf.mxu0 }
 0x292   : > { %v1674_v50 = vpop.f32.mrf.mxu1 }
 0x293   : > { %v1065_v51 = vadd.f32 %v1674_v50, %v1642_v49  ;;  %v863_v52 = vpop.f32.mrf.mxu0 }
 0x294   : > { %v1056_v54 = vpop.f32.mrf.mxu1 }
 0x295   : > { %v1057_v55 = vadd.f32 %v1056_v54, %v863_v52  ;;  %v1643_v56 = vpop.f32.mrf.mxu0  ;;  %v1128_v58 = vadd.f32 %v2573_v53, %v1065_v51 }
 0x296   : > { %v1675_v57 = vpop.f32.mrf.mxu1 }
 0x297   : > { %v1068_v59 = vadd.f32 %v1675_v57, %v1643_v56  ;;  %v866_v60 = vpop.f32.mrf.mxu0  ;;  %v1126_v62 = vadd.f32 %v2573_v53, %v1057_v55  ;;  %v1144_v3 = vmax.f32 %v1128_v58, 0.0 }
 0x298   : > { %v1059_v61 = vpop.f32.mrf.mxu1 }
 0x299   : > { %v1129_v63 = vadd.f32 %v2573_v53, %v1068_v59  ;;  %v1060_v0 = vadd.f32 %v1059_v61, %v866_v60  ;;  %v1646_v1 = vpop.f32.mrf.mxu0  ;;  %v1142_v9 = vmax.f32 %v1126_v62, 0.0 }
 0x29a   : > { %v1678_v2 = vpop.f32.mrf.mxu1 }
 0x29b   : > { %v1145_v4 = vmax.f32 %v1129_v63, 0.0  ;;  %v1127_v5 = vadd.f32 %v2573_v53, %v1060_v0  ;;  %v1081_v6 = vadd.f32 %v1678_v2, %v1646_v1  ;;  %v879_v7 = vpop.f32.mrf.mxu0 }
 0x29c   : > { %v1072_v8 = vpop.f32.mrf.mxu1 }
 0x29d   : > { %v1505_v10 = vpack.c.bf16 %v1145_v4, %v1144_v3  ;;  %v1143_v11 = vmax.f32 %v1127_v5, 0.0  ;;  %v1073_v12 = vadd.f32 %v1072_v8, %v879_v7  ;;  %v1647_v13 = vpop.f32.mrf.mxu0  ;;  %v1132_v16 = vadd.f32 %v2573_v53, %v1081_v6 }
 0x29e   : > { %v1679_v14 = vpop.f32.mrf.mxu1 }
 0x29f   : > { %1537 = vst [vmem:[%s2545_s14 + $0x8] sm:$0xff] %v1505_v10   ;;  %v1500_v15 = vpack.c.bf16 %v1143_v11, %v1142_v9  ;;  %v1084_v17 = vadd.f32 %v1679_v14, %v1647_v13  ;;  %v882_v18 = vpop.f32.mrf.mxu0  ;;  %v1130_v20 = vadd.f32 %v2573_v53, %v1073_v12  ;;  %v1148_v25 = vmax.f32 %v1132_v16, 0.0 }
 0x2a0   : > { %v1075_v19 = vpop.f32.mrf.mxu1 }
 0x2a1   : > { %1501 = vst [vmem:[%s2545_s14] sm:$0xff] %v1500_v15   ;;  %v1133_v21 = vadd.f32 %v2573_v53, %v1084_v17  ;;  %v1076_v22 = vadd.f32 %v1075_v19, %v882_v18  ;;  %v1650_v23 = vpop.f32.mrf.mxu0  ;;  %v1146_v31 = vmax.f32 %v1130_v20, 0.0 }
 0x2a2   : > { %v1682_v24 = vpop.f32.mrf.mxu1 }
 0x2a3   : > { %v1149_v26 = vmax.f32 %v1133_v21, 0.0  ;;  %v1131_v27 = vadd.f32 %v2573_v53, %v1076_v22  ;;  %v1097_v28 = vadd.f32 %v1682_v24, %v1650_v23  ;;  %v895_v29 = vpop.f32.mrf.mxu0 }
 0x2a4   : > { %v1088_v30 = vpop.f32.mrf.mxu1 }
 0x2a5   : > { %v1515_v32 = vpack.c.bf16 %v1149_v26, %v1148_v25  ;;  %v1147_v33 = vmax.f32 %v1131_v27, 0.0  ;;  %v1089_v34 = vadd.f32 %v1088_v30, %v895_v29  ;;  %v1651_v35 = vpop.f32.mrf.mxu0  ;;  %v1136_v38 = vadd.f32 %v2573_v53, %v1097_v28 }
 0x2a6   : > { %v1683_v36 = vpop.f32.mrf.mxu1 }
 0x2a7   : > { %1539 = vst [vmem:[%s2545_s14 + $0x18] sm:$0xff] %v1515_v32   ;;  %v1510_v37 = vpack.c.bf16 %v1147_v33, %v1146_v31  ;;  %v1100_v39 = vadd.f32 %v1683_v36, %v1651_v35  ;;  %v898_v40 = vpop.f32.mrf.mxu0  ;;  %v1134_v42 = vadd.f32 %v2573_v53, %v1089_v34  ;;  %v1152_v47 = vmax.f32 %v1136_v38, 0.0 }
 0x2a8   : > { %v1091_v41 = vpop.f32.mrf.mxu1 }
 0x2a9   : > { %1538 = vst [vmem:[%s2545_s14 + $0x10] sm:$0xff] %v1510_v37   ;;  %v1137_v43 = vadd.f32 %v2573_v53, %v1100_v39  ;;  %v1092_v44 = vadd.f32 %v1091_v41, %v898_v40  ;;  %v1654_v45 = vpop.f32.mrf.mxu0  ;;  %v1150_v54 = vmax.f32 %v1134_v42, 0.0 }
 0x2aa   : > { %v1686_v46 = vpop.f32.mrf.mxu1 }
 0x2ab   : > { %v1153_v48 = vmax.f32 %v1137_v43, 0.0  ;;  %v1135_v49 = vadd.f32 %v2573_v53, %v1092_v44  ;;  %v1113_v50 = vadd.f32 %v1686_v46, %v1654_v45  ;;  %v911_v51 = vpop.f32.mrf.mxu0 }
 0x2ac   : > { %v1104_v52 = vpop.f32.mrf.mxu1 }
 0x2ad   : > { %v1525_v55 = vpack.c.bf16 %v1153_v48, %v1152_v47  ;;  %v1151_v56 = vmax.f32 %v1135_v49, 0.0  ;;  %v1105_v57 = vadd.f32 %v1104_v52, %v911_v51  ;;  %v1655_v58 = vpop.f32.mrf.mxu0  ;;  %v1140_v61 = vadd.f32 %v2573_v53, %v1113_v50 }
 0x2ae   : > { %v1687_v59 = vpop.f32.mrf.mxu1 }
 0x2af   : > { %1541 = vst [vmem:[%s2545_s14 + $0x28] sm:$0xff] %v1525_v55   ;;  %v1520_v60 = vpack.c.bf16 %v1151_v56, %v1150_v54  ;;  %v1116_v62 = vadd.f32 %v1687_v59, %v1655_v58  ;;  %v914_v63 = vpop.f32.mrf.mxu0  ;;  %v1138_v1 = vadd.f32 %v2573_v53, %v1105_v57  ;;  %v1156_v4 = vmax.f32 %v1140_v61, 0.0 }
 0x2b0   : > { %v1107_v0 = vpop.f32.mrf.mxu1 }
 0x2b1   : > { %1540 = vst [vmem:[%s2545_s14 + $0x20] sm:$0xff] %v1520_v60   ;;  %v1141_v2 = vadd.f32 %v2573_v53, %v1116_v62  ;;  %v1108_v3 = vadd.f32 %v1107_v0, %v914_v63  ;;  %v1154_v7 = vmax.f32 %v1138_v1, 0.0 }
 0x2b3   : > { %v1157_v5 = vmax.f32 %v1141_v2, 0.0  ;;  %v1139_v6 = vadd.f32 %v2573_v53, %v1108_v3 }
 0x2b5   : > { %v1535_v8 = vpack.c.bf16 %v1157_v5, %v1156_v4  ;;  %v1155_v9 = vmax.f32 %v1139_v6, 0.0 }
 0x2b7   : > { %1543 = vst [vmem:[%s2545_s14 + $0x38] sm:$0xff] %v1535_v8   ;;  %v1530_v10 = vpack.c.bf16 %v1155_v9, %v1154_v7 }
 0x2b9   : > { %1542 = vst [vmem:[%s2545_s14 + $0x30] sm:$0xff] %v1530_v10  }
 0x2ba PF: > { %s24_s10 = sadd.s32 1, %s2200_s10   ;;  %s2718_s24 = sld [smem:[#allocation19_spill]] }
 0x2bb   : > { %p2600_p13 = scmp.ge.s32.totalorder %s24_s10, 6   ;;  %s2719_s6 = sld [smem:[#allocation25_spill]] }
 0x2bc   : > { %s2720_s15 = sld [smem:[#allocation23_spill]]  ;;  %s2723_s21 = smov %s2152_s22 }
 0x2bd   : > { %s2721_s3 = sld [smem:[#allocation24_spill]]  ;;  %s2724_s22 = smov %s2156_s23 }
 0x2be   : > { %s2725_s23 = smov %s2475_s30  ;;  %s2726_s25 = smov %s2168_s26 }
 0x2bf   : > { %s2728_s27 = smov %s2176_s28  ;;  %s2729_s28 = smov %s2180_s29 }
 0x2c0   : > { %s2730_s29 = smov %s2439_s16  ;;  %s2731_s30 = smov %s2192_s8 }
 0x2c1   : > { %s2727_s26 = smov %s2719_s6  ;;  %s2732_s7 = smov %s2196_s9 }
 0x2c2   : > { %s2733_s8 = smov %s2720_s15  ;;  %23 = sbr.rel (!%p2600_p13) target bundleno = 18 (0x12), region = 128 }
 0x2c3   : > { %s2734_s9 = smov %s2721_s3 }
 0x2c7   :  { %1260 = vsyncpa [#allocation4], 1 }
 0x2c8   :  { %1262 = vsyncpa [#allocation4 + $0x1], 1 }
 0x2c9   :  { %1263 = vsyncpa [#allocation6], 1 }
 0x2ca   :  { %1265 = vsyncpa [#allocation6 + $0x1], 1 }
 0x2cb   :  { %1266 = vsyncpa [#allocation9], 1 }
 0x2cc   :  { %1267 = vsyncpa [#allocation12], 1 }

// kernel: graphsage_forward.3
= control target key start
LH: loop header
LB: loop body
LE: loop exit
PB: predicated region body
PF: predicated region fallthrough
CT: control target
= control target key end

     0   :  { %s2468_s0 = inlined_call_operand.vmem [shape: bf16[256,256], index: 0, kind: input, shape index: {}]   ;;  %s2469_s1 = inlined_call_operand.vmem [shape: bf16[256,128], index: 1, kind: input, shape index: {}, may-alias: {1,2}]   ;;  %s2470_s2 = inlined_call_operand.vmem [shape: bf16[256,128], index: 2, kind: input, shape index: {}, may-alias: {1,2}]   ;;  %s2471_s3 = inlined_call_operand.vmem [shape: bf16[128,128], index: 3, kind: input, shape index: {}]   ;;  %s2472_s4 = inlined_call_operand.vmem [shape: bf16[128,128], index: 4, kind: input, shape index: {}]   ;;  %s2473_s5 = inlined_call_operand.vmem [shape: f32[1,128], index: 5, kind: input, shape index: {}]   ;;  %s2474_s6 = inlined_call_operand.vmem [shape: bf16[128,128], index: 6, kind: input, shape index: {}]   ;;  %s2475_s7 = inlined_call_operand.vmem [shape: f32[1,128], index: 7, kind: input, shape index: {}]   ;;  %s2476_s8 = inlined_call_operand.hbm [shape: f32[256,128], index: 8, kind: output, shape index: {}]  }
   0x1   :  { %2484 = sst [smem:[#allocation13_spill]] %s2468_s0 }
   0x2   :  { %13 = vsyncpa [#allocation5], 0 }
   0x3   :  { %15 = vsyncpa [#allocation5 + $0x1], 0  ;;  %s2123_s27 = smov 0   ;;  %s2125_s28 = smov 0  }
   0x4   :  { %s2127_s29 = smov 0   ;;  %s2129_s30 = smov 0  }
   0x5   :  { %s2131_s9 = smov 0   ;;  %s2133_s10 = smov 0  }
   0x6   :  { %s2135_s11 = smov 0   ;;  %s2137_s12 = smov 0  }
   0x7   :  { %s2139_s13 = smov 0   ;;  %s2141_s14 = smov 0  }
   0x8 LB: > { %2485 = sst [smem:[#allocation7_spill]] %s2036_s27  ;;  %s1528_s15 = sadd.s32 4294967295, %s2072_s14   ;;  %s2072_s14 = sphi %s2141_s14, %s21_s14   ;;  %s2068_s13 = sphi %s2139_s13, %s2501_s13   ;;  %s2064_s12 = sphi %s2137_s12, %s2500_s12   ;;  %s2060_s11 = sphi %s2135_s11, %s2499_s11   ;;  %s2056_s10 = sphi %s2133_s10, %s2498_s10   ;;  %s2052_s9 = sphi %s2131_s9, %s2506_s9   ;;  %s2048_s30 = sphi %s2129_s30, %s2505_s30   ;;  %s2044_s29 = sphi %s2127_s29, %s2504_s29   ;;  %s2040_s28 = sphi %s2125_s28, %s2503_s28   ;;  %s2036_s27 = sphi %s2123_s27, %s2502_s27  }
   0x9   : > { %2486 = sst [smem:[#allocation8_spill]] %s2064_s12  ;;  %s1529_s16 = sadd.s32 4294967294, %s2072_s14  }
   0xa   : > { %2487 = sst [smem:[#allocation9_spill]] %s2068_s13  ;;  %s30_s17 = sadd.s32 1, %s2064_s12 }
   0xb   : > { %s33_s18 = sadd.s32 1, %s2068_s13  ;;  %p31_p0 = scmp.ge.s32.totalorder %s30_s17, 2 }
   0xc   : > { %s42_s19 = sadd.s32 1, %s2052_s9  ;;  %p49_p1 = scmp.ne.s32.totalorder %s2052_s9, %s2048_s30 }
   0xd   : > { %p50_p2 = scmp.eq.s32.totalorder %s2072_s14, 0  ;;  %s2508_s17 = smov (%p31_p0, %s30_s17), 0 }
   0xe   : > { %2488 = sst [smem:[#allocation10_spill]] %s2508_s17  ;;  %s2510_s18 = smov (!%p31_p0, %s33_s18), %s2068_s13 }
   0xf   : > { %s38_s20 = ssub.s32 %s2064_s12, %s2508_s17  ;;  %p2186_p3 = por %p50_p2, %p49_p1 }
  0x10   : > { %p35_p4 = scmp.ge.s32.totalorder %s2510_s18, 2  ;;  %s225_s22 = sadd.s32 1, %s2044_s29 }
  0x11   : > { %p235_p5 = scmp.ne.s32.totalorder %s2044_s29, %s2040_s28  ;;  %p236_p6 = scmp.eq.s32.totalorder %s1528_s15, 3 }
  0x12   : > { %s2512_s18 = smov (%p35_p4, %s2510_s18), 0  ;;  %p241_p8 = scmp.ne.s32.totalorder %s2040_s28, %s2036_s27 }
  0x13   : > { %2490 = sst [smem:[#allocation11_spill]] %s2512_s18  ;;  %p2195_p7 = por %p236_p6, %p235_p5 }
  0x14   : > { %s37_s24 = ssub.s32 %s2068_s13, %s2512_s18  ;;  %p242_p9 = scmp.eq.s32.totalorder %s1529_s16, 3 }
  0x15   : > { %s39_s25 = sor.u32 %s38_s20, %s37_s24  ;;  %p223_p10 = scmp.eq.s32.totalorder %s37_s24, 0 }
  0x16   : > { %p40_p11 = scmp.eq.s32.totalorder %s39_s25, 0  ;;  %p2203_p12 = por %p242_p9, %p241_p8 }
  0x17   : > { %s2208_s17 = scalar_select %p223_p10, %s2044_s29, %s225_s22  }
  0x18   : > { %s2492_s26 = scalar_select %p2203_p12, 1, 0 }
  0x19   : > { %s2211_s15 = scalar_select %p40_p11, %s2052_s9, %s42_s19  }
  0x1a   : > { %2493 = sst [smem:[#allocation12_spill]] %s2492_s26  ;;  %p1531_p13 = scmp.ge.s32.totalorder %s2072_s14, 4 }
  0x1c   : > { %273 = sbr.rel (%p1531_p13) target bundleno = 53 (0x35), region = 36 }
  0x21   : > { %276 = sbr.rel (!%p2186_p3) target bundleno = 53 (0x35), region = 40  ;;  %s278_s16 = sand.u32 (%p2186_p3), 1, %s2052_s9  }
  0x22   : > { %s1600_s20 = sshll.u32 (%p2186_p3), %s2068_s13, 5  ;;  %s1532_s24 = sshll.u32 (%p2186_p3), %s278_s16, 6 }
  0x23   : > { %s283_s25 = sadd.s32 (%p2186_p3), %s2064_s12, %s1600_s20  ;;  %s2494_s0 = sld [smem:[#allocation13_spill]] (%p2186_p3) }
  0x24   : > { %s1535_s18 = sshll.u32 (%p2186_p3), %s283_s25, 2  ;;  %s280_s19 = scalar_lea.vmem (%p2186_p3), [#allocation3], %s1532_s24 }
  0x29   : > { %s2222_s22 = scalar_lea.vmem %s2494_s0, %s1535_s18 }
  0x2a   : > { %v302_v0 = vld [vmem:[%s2222_s22] sm:$0xf]  ;;  %v304_v1 = vld [vmem:[%s2222_s22 + $0x8] sm:$0xf]  ;;  %v306_v2 = vld [vmem:[%s2222_s22 + $0x10] sm:$0xf] }
  0x2b   : > { %303 = vst [vmem:[%s280_s19] sm:$0xf] %v302_v0  ;;  %305 = vst [vmem:[%s280_s19 + $0x4] sm:$0xf] %v304_v1  ;;  %v308_v3 = vld [vmem:[%s2222_s22 + $0x18] sm:$0xf] }
  0x2c   : > { %307 = vst [vmem:[%s280_s19 + $0x8] sm:$0xf] %v306_v2  ;;  %v310_v4 = vld [vmem:[%s2222_s22 + $0x20] sm:$0xf]  ;;  %v312_v5 = vld [vmem:[%s2222_s22 + $0x28] sm:$0xf] }
  0x2d   : > { %309 = vst [vmem:[%s280_s19 + $0xc] sm:$0xf] %v308_v3  ;;  %311 = vst [vmem:[%s280_s19 + $0x10] sm:$0xf] %v310_v4  ;;  %v314_v6 = vld [vmem:[%s2222_s22 + $0x30] sm:$0xf] }
  0x2e   : > { %313 = vst [vmem:[%s280_s19 + $0x14] sm:$0xf] %v312_v5  ;;  %v316_v7 = vld [vmem:[%s2222_s22 + $0x38] sm:$0xf]  ;;  %v318_v8 = vld [vmem:[%s2222_s22 + $0x40] sm:$0xf] }
  0x2f   : > { %315 = vst [vmem:[%s280_s19 + $0x18] sm:$0xf] %v314_v6  ;;  %317 = vst [vmem:[%s280_s19 + $0x1c] sm:$0xf] %v316_v7  ;;  %v320_v9 = vld [vmem:[%s2222_s22 + $0x48] sm:$0xf] }
  0x30   : > { %319 = vst [vmem:[%s280_s19 + $0x20] sm:$0xf] %v318_v8  ;;  %v322_v10 = vld [vmem:[%s2222_s22 + $0x50] sm:$0xf]  ;;  %v324_v11 = vld [vmem:[%s2222_s22 + $0x58] sm:$0xf] }
  0x31   : > { %321 = vst [vmem:[%s280_s19 + $0x24] sm:$0xf] %v320_v9  ;;  %323 = vst [vmem:[%s280_s19 + $0x28] sm:$0xf] %v322_v10  ;;  %v326_v12 = vld [vmem:[%s2222_s22 + $0x60] sm:$0xf] }
  0x32   : > { %325 = vst [vmem:[%s280_s19 + $0x2c] sm:$0xf] %v324_v11  ;;  %v328_v13 = vld [vmem:[%s2222_s22 + $0x68] sm:$0xf]  ;;  %v330_v14 = vld [vmem:[%s2222_s22 + $0x70] sm:$0xf] }
  0x33   : > { %327 = vst [vmem:[%s280_s19 + $0x30] sm:$0xf] %v326_v12  ;;  %329 = vst [vmem:[%s280_s19 + $0x34] sm:$0xf] %v328_v13  ;;  %v332_v15 = vld [vmem:[%s2222_s22 + $0x78] sm:$0xf] }
  0x34   : > { %331 = vst [vmem:[%s280_s19 + $0x38] sm:$0xf] %v330_v14  ;;  %333 = vst [vmem:[%s280_s19 + $0x3c] sm:$0xf] %v332_v15 }
  0x35 PF: > { %p1536_p0 = scmp.ge.s32.totalorder %s2072_s14, 1  ;;  %p406_p1 = scmp.lt.s32.totalorder %s2072_s14, 5 }
  0x37   : > { %p407_p2 = pnand %p1536_p0, %p406_p1 }
  0x38   : > { %s413_s27 = sand.u32 (!%p407_p2), 1, %s2048_s30   ;;  %s2483_s18 = sand.u32 (!%p407_p2), 1, %s2040_s28  }
  0x39   : > { %410 = sbr.rel (%p407_p2) target bundleno = 815 (0x32f), region = 89  ;;  %s1537_s21 = sshll.u32 (!%p407_p2), %s413_s27, 6 }
  0x3a   : > { %s1538_s26 = sshll.u32 (!%p407_p2), %s2483_s18, 7  ;;  %s1539_s16 = sshll.u32 (!%p407_p2), %s2056_s10, 4 }
  0x3b   : > { %s1541_s20 = sshll.u32 (!%p407_p2), %s2060_s11, 4  ;;  %p458_p3 = scmp.lt.s32.totalorder (!%p407_p2), %s1539_s16, 31 }
  0x3c   : > { %p464_p4 = scmp.lt.s32.totalorder (!%p407_p2), %s1541_s20, 31  ;;  %s2258_s27 = scalar_lea.vmem (!%p407_p2), [#allocation3], %s1537_s21 }
  0x3d   : > { %s2260_s18 = scalar_lea.vmem (!%p407_p2), [#allocation4], %s1538_s26  ;;  %p1543_p5 = scmp.ne.s32.totalorder (!%p407_p2), %s2056_s10, 0 }
  0x3e   : > { %s2514_s16 = smov (!%p458_p3, %s1539_s16), 31  ;;  %s2516_s20 = smov (!%p464_p4, %s1541_s20), 31 }
  0x3f   : > { %s1540_s24 = sshll.u32 %s2514_s16, 2  ;;  %s1542_s0 = sshll.u32 %s2516_s20, 2 }
  0x40   : > { %s2251_s19 = scalar_lea.vmem %s2469_s1, %s1540_s24  ;;  %s2256_s30 = scalar_lea.vmem %s2470_s2, %s1542_s0 }
  0x41   : > { %474 = sbr.rel (%p1543_p5) target bundleno = 79 (0x4f), region = 97 }
  0x46   : > { %v2074_v16 = vmov 0.0  }
  0x47   : > { %475 = vst [vmem:[#allocation2 + $0x30] sm:$0xff] %v2074_v16  ;;  %476 = vst [vmem:[#allocation2] sm:$0xff] %v2074_v16 }
  0x48   : > { %477 = vst [vmem:[#allocation2 + $0x58] sm:$0xff] %v2074_v16  ;;  %478 = vst [vmem:[#allocation2 + $0x18] sm:$0xff] %v2074_v16 }
  0x49   : > { %479 = vst [vmem:[#allocation2 + $0x50] sm:$0xff] %v2074_v16  ;;  %480 = vst [vmem:[#allocation2 + $0x68] sm:$0xff] %v2074_v16 }
  0x4a   : > { %481 = vst [vmem:[#allocation2 + $0x8] sm:$0xff] %v2074_v16  ;;  %482 = vst [vmem:[#allocation2 + $0x48] sm:$0xff] %v2074_v16 }
  0x4b   : > { %483 = vst [vmem:[#allocation2 + $0x40] sm:$0xff] %v2074_v16  ;;  %484 = vst [vmem:[#allocation2 + $0x20] sm:$0xff] %v2074_v16 }
  0x4c   : > { %485 = vst [vmem:[#allocation2 + $0x10] sm:$0xff] %v2074_v16  ;;  %486 = vst [vmem:[#allocation2 + $0x38] sm:$0xff] %v2074_v16 }
  0x4d   : > { %487 = vst [vmem:[#allocation2 + $0x60] sm:$0xff] %v2074_v16  ;;  %488 = vst [vmem:[#allocation2 + $0x70] sm:$0xff] %v2074_v16 }
  0x4e   : > { %489 = vst [vmem:[#allocation2 + $0x78] sm:$0xff] %v2074_v16  ;;  %490 = vst [vmem:[#allocation2 + $0x28] sm:$0xff] %v2074_v16 }
  0x4f PF: > { %v1916_v17 = vld [vmem:[%s2251_s19 + $0x38] sm:$0xff]   ;;  %v1917_v18 = vld [vmem:[%s2251_s19 + $0x30] sm:$0xff]   ;;  %v1918_v19 = vld [vmem:[%s2251_s19 + $0x28] sm:$0xff]   ;;  %p1560_p6 = scmp.ne.s32.totalorder %s2056_s10, 1 }
  0x50   : > { %1666 = vmatprep.subr.bf16.mxu0 %v1916_v17  ;;  %1794 = vmatprep.subr.bf16.mxu1 %v1916_v17  ;;  %v1919_v20 = vld [vmem:[%s2251_s19 + $0x20] sm:$0xff]   ;;  %v1920_v23 = vld [vmem:[%s2251_s19 + $0x18] sm:$0xff]   ;;  %v1921_v24 = vld [vmem:[%s2251_s19 + $0x10] sm:$0xff]  }
  0x51   : > { %1667 = vmatpush3.bf16.msra.mxu0 %v1916_v17  ;;  %1802 = vmatpush3.bf16.msra.mxu1 %v1916_v17  ;;  %v1924_v21 = vld [vmem:[%s2258_s27] sm:$0xff]   ;;  %v1922_v25 = vld [vmem:[%s2251_s19 + $0x8] sm:$0xff]   ;;  %v1928_v29 = vld [vmem:[%s2258_s27 + $0x10] sm:$0xff]  }
  0x52   : > { %1668 = vmatprep.subr.bf16.mxu0 %v1917_v18  ;;  %1795 = vmatprep.subr.bf16.mxu1 %v1917_v18  ;;  %v1925_v22 = vld [vmem:[%s2258_s27 + $0x20] sm:$0xff]   ;;  %v1926_v27 = vld [vmem:[%s2258_s27 + $0x8] sm:$0xff]   ;;  %v1929_v30 = vld [vmem:[%s2258_s27 + $0x30] sm:$0xff]  }
  0x53   : > { %1682 = vmatprep.mubr.bf16.mxu0 %v1924_v21  ;;  %1690 = vmatprep.mubr.bf16.mxu1 %v1925_v22  ;;  %v1923_v26 = vld [vmem:[%s2251_s19] sm:$0xff]   ;;  %v1927_v28 = vld [vmem:[%s2258_s27 + $0x28] sm:$0xff]   ;;  %v1930_v31 = vld [vmem:[%s2258_s27 + $0x18] sm:$0xff]  }
  0x54   : > { %v1931_v32 = vld [vmem:[%s2258_s27 + $0x38] sm:$0xff]   ;;  %v501_v34 = vld [vmem:[#allocation2 + $0x10] sm:$0xff]  ;;  %v499_v38 = vld [vmem:[#allocation2 + $0x40] sm:$0xff] }
  0x55   : > { %1669 = vmatpush3.bf16.msra.mxu0 %v1917_v18  ;;  %1803 = vmatpush3.bf16.msra.mxu1 %v1917_v18  ;;  %v493_v33 = vld [vmem:[#allocation2 + $0x58] sm:$0xff]  ;;  %v491_v37 = vld [vmem:[#allocation2 + $0x30] sm:$0xff]  ;;  %v492_v49 = vld [vmem:[#allocation2] sm:$0xff] }
  0x56   : > { %1670 = vmatprep.subr.bf16.mxu0 %v1918_v19  ;;  %1796 = vmatprep.subr.bf16.mxu1 %v1918_v19  ;;  %v494_v43 = vld [vmem:[#allocation2 + $0x18] sm:$0xff]  ;;  %v500_v50 = vld [vmem:[#allocation2 + $0x20] sm:$0xff]  ;;  %v497_v55 = vld [vmem:[#allocation2 + $0x8] sm:$0xff] }
  0x57   : > { %v502_v44 = vld [vmem:[#allocation2 + $0x38] sm:$0xff]  ;;  %v495_v61 = vld [vmem:[#allocation2 + $0x50] sm:$0xff]  ;;  %v503_v62 = vld [vmem:[#allocation2 + $0x60] sm:$0xff] }
  0x58   : > { %v505_v56 = vld [vmem:[#allocation2 + $0x78] sm:$0xff]  ;;  %v498_v3 = vld [vmem:[#allocation2 + $0x48] sm:$0xff]  ;;  %v504_v10 = vld [vmem:[#allocation2 + $0x70] sm:$0xff] }
  0x59   : > { %1671 = vmatpush3.bf16.msra.mxu0 %v1918_v19  ;;  %1804 = vmatpush3.bf16.msra.mxu1 %v1918_v19  ;;  %v506_v4 = vld [vmem:[#allocation2 + $0x28] sm:$0xff] }
  0x5a   : > { %1672 = vmatprep.subr.bf16.mxu0 %v1919_v20  ;;  %1797 = vmatprep.subr.bf16.mxu1 %v1919_v20  ;;  %v496_v9 = vld [vmem:[#allocation2 + $0x68] sm:$0xff] }
  0x5d   : > { %1673 = vmatpush3.bf16.msra.mxu0 %v1919_v20  ;;  %1805 = vmatpush3.bf16.msra.mxu1 %v1919_v20 }
  0x5e   : > { %1674 = vmatprep.subr.bf16.mxu0 %v1920_v23  ;;  %1798 = vmatprep.subr.bf16.mxu1 %v1920_v23 }
  0x61   : > { %1675 = vmatpush3.bf16.msra.mxu0 %v1920_v23  ;;  %1806 = vmatpush3.bf16.msra.mxu1 %v1920_v23 }
  0x62   : > { %1676 = vmatprep.subr.bf16.mxu0 %v1921_v24  ;;  %1799 = vmatprep.subr.bf16.mxu1 %v1921_v24 }
  0x65   : > { %1677 = vmatpush3.bf16.msra.mxu0 %v1921_v24  ;;  %1807 = vmatpush3.bf16.msra.mxu1 %v1921_v24 }
  0x66   : > { %1678 = vmatprep.subr.bf16.mxu0 %v1922_v25  ;;  %1800 = vmatprep.subr.bf16.mxu1 %v1922_v25 }
  0x69   : > { %1679 = vmatpush3.bf16.msra.mxu0 %v1922_v25  ;;  %1808 = vmatpush3.bf16.msra.mxu1 %v1922_v25 }
  0x6a   : > { %1680 = vmatprep.subr.bf16.mxu0 %v1923_v26  ;;  %1801 = vmatprep.subr.bf16.mxu1 %v1923_v26 }
  0x6d   : > { %1681 = vmatpush3.bf16.msra.mxu0 %v1923_v26  ;;  %1809 = vmatpush3.bf16.msra.mxu1 %v1923_v26 }
  0x70   : > { %1683 = vmatmul.mubr.bf16.vlgmr.msra.gmra.mxu0 %v1926_v27  ;;  %1691 = vmatmul.mubr.bf16.vlgmr.msra.gmra.mxu1 %v1927_v28 }
  0x71   : > { %1686 = vmatprep.mubr.bf16.mxu0 %v1928_v29  ;;  %1694 = vmatprep.mubr.bf16.mxu1 %v1929_v30 }
  0x78   : > { %1687 = vmatmul.mubr.bf16.gmra.mxu0 %v1930_v31  ;;  %1695 = vmatmul.mubr.bf16.gmra.mxu1 %v1931_v32 }
 0x130   : > { %v1684_v35 = vpop.f32.mrf.mxu0  ;;  %v1692_v36 = vpop.f32.mrf.mxu1 }
 0x131   : > { %v734_v39 = vadd.f32 %v1684_v35, %v493_v33  ;;  %v742_v40 = vadd.f32 %v1692_v36, %v501_v34 }
 0x132   : > { %v669_v41 = vpop.f32.mrf.mxu0  ;;  %v701_v42 = vpop.f32.mrf.mxu1 }
 0x133   : > { %750 = vst [vmem:[#allocation2 + $0x58] sm:$0xff] %v734_v39  ;;  %758 = vst [vmem:[#allocation2 + $0x10] sm:$0xff] %v742_v40  ;;  %v732_v45 = vadd.f32 %v669_v41, %v491_v37  ;;  %v740_v46 = vadd.f32 %v701_v42, %v499_v38 }
 0x134   : > { %v1685_v47 = vpop.f32.mrf.mxu0  ;;  %v1693_v48 = vpop.f32.mrf.mxu1 }
 0x135   : > { %748 = vst [vmem:[#allocation2 + $0x30] sm:$0xff] %v732_v45  ;;  %756 = vst [vmem:[#allocation2 + $0x40] sm:$0xff] %v740_v46  ;;  %v735_v51 = vadd.f32 %v1685_v47, %v494_v43  ;;  %v743_v52 = vadd.f32 %v1693_v48, %v502_v44 }
 0x136   : > { %v672_v53 = vpop.f32.mrf.mxu0  ;;  %v704_v54 = vpop.f32.mrf.mxu1 }
 0x137   : > { %751 = vst [vmem:[#allocation2 + $0x18] sm:$0xff] %v735_v51  ;;  %759 = vst [vmem:[#allocation2 + $0x38] sm:$0xff] %v743_v52  ;;  %v733_v57 = vadd.f32 %v672_v53, %v492_v49  ;;  %v741_v58 = vadd.f32 %v704_v54, %v500_v50 }
 0x138   : > { %v1688_v59 = vpop.f32.mrf.mxu0  ;;  %v1696_v60 = vpop.f32.mrf.mxu1 }
 0x139   : > { %749 = vst [vmem:[#allocation2] sm:$0xff] %v733_v57  ;;  %757 = vst [vmem:[#allocation2 + $0x20] sm:$0xff] %v741_v58  ;;  %v738_v63 = vadd.f32 %v1688_v59, %v497_v55  ;;  %v746_v0 = vadd.f32 %v1696_v60, %v505_v56 }
 0x13a   : > { %v685_v1 = vpop.f32.mrf.mxu0  ;;  %v717_v2 = vpop.f32.mrf.mxu1 }
 0x13b   : > { %754 = vst [vmem:[#allocation2 + $0x8] sm:$0xff] %v738_v63  ;;  %762 = vst [vmem:[#allocation2 + $0x78] sm:$0xff] %v746_v0  ;;  %v736_v5 = vadd.f32 %v685_v1, %v495_v61  ;;  %v744_v6 = vadd.f32 %v717_v2, %v503_v62 }
 0x13c   : > { %v1689_v7 = vpop.f32.mrf.mxu0  ;;  %v1697_v8 = vpop.f32.mrf.mxu1 }
 0x13d   : > { %752 = vst [vmem:[#allocation2 + $0x50] sm:$0xff] %v736_v5  ;;  %760 = vst [vmem:[#allocation2 + $0x60] sm:$0xff] %v744_v6  ;;  %v739_v11 = vadd.f32 %v1689_v7, %v498_v3  ;;  %v747_v12 = vadd.f32 %v1697_v8, %v506_v4  ;;  %767 = sbr.rel (%p1560_p6) target bundleno = 790 (0x316), region = 101 }
 0x13e   : > { %v688_v13 = vpop.f32.mrf.mxu0  ;;  %v720_v14 = vpop.f32.mrf.mxu1 }
 0x13f   : > { %755 = vst [vmem:[#allocation2 + $0x48] sm:$0xff] %v739_v11  ;;  %763 = vst [vmem:[#allocation2 + $0x28] sm:$0xff] %v747_v12  ;;  %v737_v15 = vadd.f32 %v688_v13, %v496_v9  ;;  %v745_v16 = vadd.f32 %v720_v14, %v504_v10 }
 0x141   : > { %753 = vst [vmem:[#allocation2 + $0x68] sm:$0xff] %v737_v15  ;;  %761 = vst [vmem:[#allocation2 + $0x70] sm:$0xff] %v745_v16 }
 0x142   : > { %v1932_v17 = vld [vmem:[%s2472_s4 + $0x38] sm:$0xff]   ;;  %v1934_v19 = vld [vmem:[%s2472_s4 + $0x30] sm:$0xff]   ;;  %v1936_v21 = vld [vmem:[%s2472_s4 + $0x28] sm:$0xff]  }
 0x143   : > { %v1933_v18 = vld [vmem:[%s2471_s3 + $0x38] sm:$0xff]   ;;  %1698 = vmatprep.subr.bf16.mxu0 %v1932_v17  ;;  %v1935_v20 = vld [vmem:[%s2471_s3 + $0x30] sm:$0xff]   ;;  %v1937_v22 = vld [vmem:[%s2471_s3 + $0x28] sm:$0xff]  }
 0x144   : > { %1730 = vmatprep.subr.bf16.mxu1 %v1933_v18  ;;  %1699 = vmatpush3.bf16.msra.mxu0 %v1932_v17  ;;  %v1938_v23 = vld [vmem:[%s2472_s4 + $0x20] sm:$0xff]   ;;  %v1940_v25 = vld [vmem:[%s2472_s4 + $0x18] sm:$0xff]   ;;  %v1942_v27 = vld [vmem:[%s2472_s4 + $0x10] sm:$0xff]  }
 0x145   : > { %1731 = vmatpush3.bf16.msra.mxu1 %v1933_v18  ;;  %1700 = vmatprep.subr.bf16.mxu0 %v1934_v19  ;;  %v1939_v24 = vld [vmem:[%s2471_s3 + $0x20] sm:$0xff]   ;;  %v1941_v26 = vld [vmem:[%s2471_s3 + $0x18] sm:$0xff]   ;;  %v784_v28 = vld [vmem:[#allocation2 + $0x30] sm:$0xff] }
 0x146   : > { %1732 = vmatprep.subr.bf16.mxu1 %v1935_v20  ;;  %v785_v29 = vld [vmem:[#allocation2] sm:$0xff]  ;;  %v1943_v30 = vld [vmem:[%s2471_s3 + $0x10] sm:$0xff]   ;;  %v1944_v33 = vld [vmem:[%s2472_s4 + $0x8] sm:$0xff]  }
 0x147   : > { %v800_v31 = vpack.c.bf16 %v785_v29, %v784_v28  ;;  %v1948_v32 = vld [vmem:[%s2256_s30] sm:$0xff]   ;;  %v1945_v34 = vld [vmem:[%s2471_s3 + $0x8] sm:$0xff]   ;;  %v786_v37 = vld [vmem:[#allocation2 + $0x58] sm:$0xff] }
 0x148   : > { %1701 = vmatpush3.bf16.msra.mxu0 %v1934_v19  ;;  %1746 = vmatprep.mubr.bf16.mxu1 %v1948_v32  ;;  %v1946_v35 = vld [vmem:[%s2472_s4] sm:$0xff]   ;;  %v787_v38 = vld [vmem:[#allocation2 + $0x18] sm:$0xff]  ;;  %v788_v39 = vld [vmem:[#allocation2 + $0x50] sm:$0xff] }
 0x149   : > { %1733 = vmatpush3.bf16.msra.mxu1 %v1935_v20  ;;  %1702 = vmatprep.subr.bf16.mxu0 %v1936_v21  ;;  %v1947_v36 = vld [vmem:[%s2471_s3] sm:$0xff]   ;;  %v789_v40 = vld [vmem:[#allocation2 + $0x68] sm:$0xff]  ;;  %v801_v41 = vpack.c.bf16 %v787_v38, %v786_v37  ;;  %v1956_v42 = vld [vmem:[%s2474_s6 + $0x38] sm:$0xff]  }
 0x14a   : > { %1734 = vmatprep.subr.bf16.mxu1 %v1937_v22  ;;  %1714 = vmatprep.mubr.bf16.mxu0 %v800_v31  ;;  %v1949_v43 = vld [vmem:[%s2256_s30 + $0x8] sm:$0xff]   ;;  %v802_v44 = vpack.c.bf16 %v789_v40, %v788_v39  ;;  %v1950_v45 = vld [vmem:[%s2256_s30 + $0x10] sm:$0xff]   ;;  %v792_v49 = vld [vmem:[#allocation2 + $0x40] sm:$0xff] }
 0x14b   : > { %v790_v46 = vld [vmem:[#allocation2 + $0x8] sm:$0xff]  ;;  %v1957_v48 = vld [vmem:[%s2474_s6 + $0x30] sm:$0xff]   ;;  %v793_v50 = vld [vmem:[#allocation2 + $0x20] sm:$0xff] }
 0x14c   : > { %1703 = vmatpush3.bf16.msra.mxu0 %v1936_v21  ;;  %v791_v47 = vld [vmem:[#allocation2 + $0x48] sm:$0xff]  ;;  %v1951_v53 = vld [vmem:[%s2256_s30 + $0x18] sm:$0xff]   ;;  %v804_v54 = vpack.c.bf16 %v793_v50, %v792_v49  ;;  %v1952_v55 = vld [vmem:[%s2256_s30 + $0x20] sm:$0xff]  }
 0x14d   : > { %1735 = vmatpush3.bf16.msra.mxu1 %v1937_v22  ;;  %1704 = vmatprep.subr.bf16.mxu0 %v1938_v23  ;;  %v1958_v51 = vld [vmem:[%s2474_s6 + $0x28] sm:$0xff]   ;;  %v803_v52 = vpack.c.bf16 %v791_v47, %v790_v46  ;;  %v1959_v56 = vld [vmem:[%s2474_s6 + $0x20] sm:$0xff]   ;;  %v794_v57 = vld [vmem:[#allocation2 + $0x10] sm:$0xff] }
 0x14e   : > { %1736 = vmatprep.subr.bf16.mxu1 %v1939_v24  ;;  %v795_v58 = vld [vmem:[#allocation2 + $0x38] sm:$0xff]  ;;  %v796_v59 = vld [vmem:[#allocation2 + $0x60] sm:$0xff]  ;;  %v797_v60 = vld [vmem:[#allocation2 + $0x70] sm:$0xff] }
 0x14f   : > { %v805_v61 = vpack.c.bf16 %v795_v58, %v794_v57  ;;  %v1953_v62 = vld [vmem:[%s2256_s30 + $0x28] sm:$0xff]   ;;  %v806_v63 = vpack.c.bf16 %v797_v60, %v796_v59  ;;  %v1954_v0 = vld [vmem:[%s2256_s30 + $0x30] sm:$0xff]   ;;  %v798_v1 = vld [vmem:[#allocation2 + $0x78] sm:$0xff] }
 0x150   : > { %1705 = vmatpush3.bf16.msra.mxu0 %v1938_v23  ;;  %v799_v2 = vld [vmem:[#allocation2 + $0x28] sm:$0xff]  ;;  %v1955_v4 = vld [vmem:[%s2256_s30 + $0x38] sm:$0xff]   ;;  %v1961_v6 = vld [vmem:[%s2474_s6 + $0x10] sm:$0xff]  }
 0x151   : > { %1737 = vmatpush3.bf16.msra.mxu1 %v1939_v24  ;;  %1706 = vmatprep.subr.bf16.mxu0 %v1940_v25  ;;  %v807_v3 = vpack.c.bf16 %v799_v2, %v798_v1  ;;  %v1960_v5 = vld [vmem:[%s2474_s6 + $0x18] sm:$0xff]   ;;  %v1962_v7 = vld [vmem:[%s2474_s6 + $0x8] sm:$0xff]   ;;  %v1963_v8 = vld [vmem:[%s2474_s6] sm:$0xff]  }
 0x152   : > { %1738 = vmatprep.subr.bf16.mxu1 %v1941_v26  ;;  %v2363_v17 = vld [vmem:[%s2473_s5] ss:$0 sm:$0xff] }
 0x154   : > { %1707 = vmatpush3.bf16.msra.mxu0 %v1940_v25 }
 0x155   : > { %1739 = vmatpush3.bf16.msra.mxu1 %v1941_v26  ;;  %1708 = vmatprep.subr.bf16.mxu0 %v1942_v27 }
 0x156   : > { %1740 = vmatprep.subr.bf16.mxu1 %v1943_v30 }
 0x158   : > { %1709 = vmatpush3.bf16.msra.mxu0 %v1942_v27 }
 0x159   : > { %1741 = vmatpush3.bf16.msra.mxu1 %v1943_v30  ;;  %1710 = vmatprep.subr.bf16.mxu0 %v1944_v33 }
 0x15a   : > { %1742 = vmatprep.subr.bf16.mxu1 %v1945_v34 }
 0x15c   : > { %1711 = vmatpush3.bf16.msra.mxu0 %v1944_v33 }
 0x15d   : > { %1743 = vmatpush3.bf16.msra.mxu1 %v1945_v34  ;;  %1712 = vmatprep.subr.bf16.mxu0 %v1946_v35 }
 0x15e   : > { %1744 = vmatprep.subr.bf16.mxu1 %v1947_v36 }
 0x160   : > { %1713 = vmatpush3.bf16.msra.mxu0 %v1946_v35 }
 0x161   : > { %1745 = vmatpush3.bf16.msra.mxu1 %v1947_v36  ;;  %1762 = vmatprep.subr.bf16.mxu0 %v1956_v42 }
 0x162   : > { %1810 = vmatprep.subr.bf16.mxu1 %v1956_v42 }
 0x163   : > { %1715 = vmatmul.mubr.bf16.vlgmr.msra.gmra.mxu0 %v801_v41 }
 0x164   : > { %1747 = vmatmul.mubr.bf16.vlgmr.msra.gmra.mxu1 %v1949_v43  ;;  %1718 = vmatprep.mubr.bf16.mxu0 %v802_v44 }
 0x165   : > { %1750 = vmatprep.mubr.bf16.mxu1 %v1950_v45  ;;  %1763 = vmatpush3.bf16.msra.mxu0 %v1956_v42 }
 0x166   : > { %1764 = vmatprep.subr.bf16.mxu0 %v1957_v48  ;;  %1818 = vmatpush3.bf16.msra.mxu1 %v1956_v42 }
 0x167   : > { %1811 = vmatprep.subr.bf16.mxu1 %v1957_v48 }
 0x169   : > { %1765 = vmatpush3.bf16.msra.mxu0 %v1957_v48 }
 0x16a   : > { %1766 = vmatprep.subr.bf16.mxu0 %v1958_v51  ;;  %1819 = vmatpush3.bf16.msra.mxu1 %v1957_v48 }
 0x16b   : > { %1719 = vmatmul.mubr.bf16.gmra.mxu0 %v803_v52  ;;  %1812 = vmatprep.subr.bf16.mxu1 %v1958_v51 }
 0x16c   : > { %1751 = vmatmul.mubr.bf16.gmra.mxu1 %v1951_v53  ;;  %1722 = vmatprep.mubr.bf16.mxu0 %v804_v54 }
 0x16d   : > { %1754 = vmatprep.mubr.bf16.mxu1 %v1952_v55  ;;  %1767 = vmatpush3.bf16.msra.mxu0 %v1958_v51 }
 0x16e   : > { %1768 = vmatprep.subr.bf16.mxu0 %v1959_v56  ;;  %1820 = vmatpush3.bf16.msra.mxu1 %v1958_v51 }
 0x16f   : > { %1813 = vmatprep.subr.bf16.mxu1 %v1959_v56 }
 0x171   : > { %1769 = vmatpush3.bf16.msra.mxu0 %v1959_v56 }
 0x172   : > { %1821 = vmatpush3.bf16.msra.mxu1 %v1959_v56  ;;  %1770 = vmatprep.subr.bf16.mxu0 %v1960_v5 }
 0x173   : > { %1723 = vmatmul.mubr.bf16.gmra.mxu0 %v805_v61  ;;  %1814 = vmatprep.subr.bf16.mxu1 %v1960_v5 }
 0x174   : > { %1755 = vmatmul.mubr.bf16.gmra.mxu1 %v1953_v62  ;;  %1726 = vmatprep.mubr.bf16.mxu0 %v806_v63 }
 0x175   : > { %1758 = vmatprep.mubr.bf16.mxu1 %v1954_v0  ;;  %1771 = vmatpush3.bf16.msra.mxu0 %v1960_v5 }
 0x176   : > { %1822 = vmatpush3.bf16.msra.mxu1 %v1960_v5  ;;  %1772 = vmatprep.subr.bf16.mxu0 %v1961_v6 }
 0x177   : > { %1815 = vmatprep.subr.bf16.mxu1 %v1961_v6 }
 0x179   : > { %1773 = vmatpush3.bf16.msra.mxu0 %v1961_v6 }
 0x17a   : > { %1823 = vmatpush3.bf16.msra.mxu1 %v1961_v6  ;;  %1774 = vmatprep.subr.bf16.mxu0 %v1962_v7 }
 0x17b   : > { %1727 = vmatmul.mubr.bf16.gmra.mxu0 %v807_v3  ;;  %1816 = vmatprep.subr.bf16.mxu1 %v1962_v7 }
 0x17c   : > { %1759 = vmatmul.mubr.bf16.gmra.mxu1 %v1955_v4 }
 0x17d   : > { %1775 = vmatpush3.bf16.msra.mxu0 %v1962_v7 }
 0x17e   : > { %1824 = vmatpush3.bf16.msra.mxu1 %v1962_v7  ;;  %1776 = vmatprep.subr.bf16.mxu0 %v1963_v8 }
 0x17f   : > { %1817 = vmatprep.subr.bf16.mxu1 %v1963_v8 }
 0x181   : > { %1777 = vmatpush3.bf16.msra.mxu0 %v1963_v8 }
 0x182   : > { %1825 = vmatpush3.bf16.msra.mxu1 %v1963_v8 }
 0x223   : > { %v1716_v9 = vpop.f32.mrf.mxu0 }
 0x224   : > { %v1748_v10 = vpop.f32.mrf.mxu1 }
 0x225   : > { %v922_v11 = vpop.f32.mrf.mxu0  ;;  %v1124_v15 = vadd.f32 %v1748_v10, %v1716_v9 }
 0x226   : > { %v1115_v12 = vpop.f32.mrf.mxu1 }
 0x227   : > { %v1116_v13 = vadd.f32 %v1115_v12, %v922_v11  ;;  %v1717_v14 = vpop.f32.mrf.mxu0  ;;  %v1187_v25 = vadd.f32 %v2363_v17, %v1124_v15 }
 0x228   : > { %v1749_v16 = vpop.f32.mrf.mxu1 }
 0x229   : > { %v1127_v18 = vadd.f32 %v1749_v16, %v1717_v14  ;;  %v925_v19 = vpop.f32.mrf.mxu0  ;;  %v1185_v21 = vadd.f32 %v2363_v17, %v1116_v13  ;;  %v1203_v35 = vmax.f32 %v1187_v25, 0.0 }
 0x22a   : > { %v1118_v20 = vpop.f32.mrf.mxu1 }
 0x22b   : > { %v1188_v22 = vadd.f32 %v2363_v17, %v1127_v18  ;;  %v1119_v23 = vadd.f32 %v1118_v20, %v925_v19  ;;  %v1720_v24 = vpop.f32.mrf.mxu0  ;;  %v1201_v31 = vmax.f32 %v1185_v21, 0.0 }
 0x22c   : > { %v1752_v26 = vpop.f32.mrf.mxu1 }
 0x22d   : > { %v1186_v27 = vadd.f32 %v2363_v17, %v1119_v23  ;;  %v938_v28 = vpop.f32.mrf.mxu0  ;;  %v1204_v29 = vmax.f32 %v1188_v22, 0.0  ;;  %v1140_v36 = vadd.f32 %v1752_v26, %v1720_v24 }
 0x22e   : > { %v1131_v30 = vpop.f32.mrf.mxu1 }
 0x22f   : > { %v1202_v32 = vmax.f32 %v1186_v27, 0.0  ;;  %v1132_v33 = vadd.f32 %v1131_v30, %v938_v28  ;;  %v1721_v34 = vpop.f32.mrf.mxu0  ;;  %v1218_v41 = vpack.c.bf16 %v1204_v29, %v1203_v35  ;;  %v1191_v47 = vadd.f32 %v2363_v17, %v1140_v36  ;;  %v1586_v35 = vld [vmem:[%s2475_s7] ss:$0 sm:$0xff] }
 0x230   : > { %v1753_v37 = vpop.f32.mrf.mxu1 }
 0x231   : > { %v1143_v38 = vadd.f32 %v1753_v37, %v1721_v34  ;;  %v941_v39 = vpop.f32.mrf.mxu0  ;;  %v1217_v40 = vpack.c.bf16 %v1202_v32, %v1201_v31  ;;  %v1189_v43 = vadd.f32 %v2363_v17, %v1132_v33  ;;  %v1207_v57 = vmax.f32 %v1191_v47, 0.0 }
 0x232   : > { %v1134_v42 = vpop.f32.mrf.mxu1 }
 0x233   : > { %v1192_v44 = vadd.f32 %v2363_v17, %v1143_v38  ;;  %v1135_v45 = vadd.f32 %v1134_v42, %v941_v39  ;;  %1778 = vmatprep.mubr.bf16.mxu0 %v1217_v40  ;;  %v1724_v46 = vpop.f32.mrf.mxu0  ;;  %v1205_v53 = vmax.f32 %v1189_v43, 0.0 }
 0x234   : > { %v1756_v48 = vpop.f32.mrf.mxu1  ;;  %1779 = vmatmul.mubr.bf16.vlgmr.msra.gmra.mxu0 %v1218_v41 }
 0x235   : > { %v1190_v49 = vadd.f32 %v2363_v17, %v1135_v45  ;;  %v954_v50 = vpop.f32.mrf.mxu0  ;;  %v1208_v51 = vmax.f32 %v1192_v44, 0.0  ;;  %v1156_v58 = vadd.f32 %v1756_v48, %v1724_v46 }
 0x236   : > { %v1147_v52 = vpop.f32.mrf.mxu1 }
 0x237   : > { %v1206_v54 = vmax.f32 %v1190_v49, 0.0  ;;  %v1148_v55 = vadd.f32 %v1147_v52, %v954_v50  ;;  %v1725_v56 = vpop.f32.mrf.mxu0  ;;  %v1220_v0 = vpack.c.bf16 %v1208_v51, %v1207_v57  ;;  %v1195_v5 = vadd.f32 %v2363_v17, %v1156_v58 }
 0x238   : > { %v1757_v59 = vpop.f32.mrf.mxu1 }
 0x239   : > { %v1159_v60 = vadd.f32 %v1757_v59, %v1725_v56  ;;  %v957_v61 = vpop.f32.mrf.mxu0  ;;  %v1219_v62 = vpack.c.bf16 %v1206_v54, %v1205_v53  ;;  %v1193_v1 = vadd.f32 %v2363_v17, %v1148_v55  ;;  %v1211_v15 = vmax.f32 %v1195_v5, 0.0 }
 0x23a   : > { %v1150_v63 = vpop.f32.mrf.mxu1 }
 0x23b   : > { %v1196_v2 = vadd.f32 %v2363_v17, %v1159_v60  ;;  %v1151_v3 = vadd.f32 %v1150_v63, %v957_v61  ;;  %1782 = vmatprep.mubr.bf16.mxu0 %v1219_v62  ;;  %v1728_v4 = vpop.f32.mrf.mxu0  ;;  %v1209_v11 = vmax.f32 %v1193_v1, 0.0 }
 0x23c   : > { %v1760_v6 = vpop.f32.mrf.mxu1  ;;  %1783 = vmatmul.mubr.bf16.gmra.mxu0 %v1220_v0 }
 0x23d   : > { %v1194_v7 = vadd.f32 %v2363_v17, %v1151_v3  ;;  %v970_v8 = vpop.f32.mrf.mxu0  ;;  %v1212_v9 = vmax.f32 %v1196_v2, 0.0  ;;  %v1172_v16 = vadd.f32 %v1760_v6, %v1728_v4 }
 0x23e   : > { %v1163_v10 = vpop.f32.mrf.mxu1 }
 0x23f   : > { %v1210_v12 = vmax.f32 %v1194_v7, 0.0  ;;  %v1164_v13 = vadd.f32 %v1163_v10, %v970_v8  ;;  %v1729_v14 = vpop.f32.mrf.mxu0  ;;  %v1222_v22 = vpack.c.bf16 %v1212_v9, %v1211_v15  ;;  %v1199_v27 = vadd.f32 %v2363_v17, %v1172_v16 }
 0x240   : > { %v1761_v18 = vpop.f32.mrf.mxu1 }
 0x241   : > { %v1175_v19 = vadd.f32 %v1761_v18, %v1729_v14  ;;  %v973_v20 = vpop.f32.mrf.mxu0  ;;  %v1221_v21 = vpack.c.bf16 %v1210_v12, %v1209_v11  ;;  %v1197_v24 = vadd.f32 %v2363_v17, %v1164_v13  ;;  %v1215_v32 = vmax.f32 %v1199_v27, 0.0 }
 0x242   : > { %v1166_v23 = vpop.f32.mrf.mxu1 }
 0x243   : > { %v1200_v25 = vadd.f32 %v2363_v17, %v1175_v19  ;;  %v1167_v26 = vadd.f32 %v1166_v23, %v973_v20  ;;  %1786 = vmatprep.mubr.bf16.mxu1 %v1221_v21  ;;  %v1213_v30 = vmax.f32 %v1197_v24, 0.0 }
 0x244   : > { %1787 = vmatmul.mubr.bf16.vlgmr.msra.gmra.mxu1 %v1222_v22 }
 0x245   : > { %v1198_v28 = vadd.f32 %v2363_v17, %v1167_v26  ;;  %v1216_v29 = vmax.f32 %v1200_v25, 0.0 }
 0x247   : > { %v1214_v31 = vmax.f32 %v1198_v28, 0.0  ;;  %v1224_v34 = vpack.c.bf16 %v1216_v29, %v1215_v32 }
 0x249   : > { %v1223_v33 = vpack.c.bf16 %v1214_v31, %v1213_v30 }
 0x24b   : > { %1790 = vmatprep.mubr.bf16.mxu1 %v1223_v33 }
 0x24c   : > { %1791 = vmatmul.mubr.bf16.gmra.mxu1 %v1224_v34 }
 0x2f4   : > { %v1780_v36 = vpop.f32.mrf.mxu0 }
 0x2f5   : > { %v1339_v37 = vadd.f32 %v1780_v36, %v1586_v35 }
 0x2f6   : > { %v1330_v38 = vpop.f32.mrf.mxu0 }
 0x2f7   : > { %1395 = vst [vmem:[%s2260_s18 + $0x10] sm:$0xff] %v1339_v37  ;;  %v1331_v17 = vadd.f32 %v1586_v35, %v1330_v38 }
 0x2f8   : > { %v1781_v39 = vpop.f32.mrf.mxu0 }
 0x2f9   : > { %1393 = vst [vmem:[%s2260_s18] sm:$0xff] %v1331_v17  ;;  %v1342_v40 = vadd.f32 %v1781_v39, %v1586_v35 }
 0x2fa   : > { %v1333_v41 = vpop.f32.mrf.mxu0 }
 0x2fb   : > { %1396 = vst [vmem:[%s2260_s18 + $0x18] sm:$0xff] %v1342_v40  ;;  %v1334_v42 = vadd.f32 %v1586_v35, %v1333_v41 }
 0x2fc   : > { %v1784_v43 = vpop.f32.mrf.mxu0 }
 0x2fd   : > { %1394 = vst [vmem:[%s2260_s18 + $0x8] sm:$0xff] %v1334_v42  ;;  %v1355_v44 = vadd.f32 %v1784_v43, %v1586_v35 }
 0x2fe   : > { %v1346_v45 = vpop.f32.mrf.mxu0 }
 0x2ff   : > { %1399 = vst [vmem:[%s2260_s18 + $0x30] sm:$0xff] %v1355_v44  ;;  %v1347_v46 = vadd.f32 %v1586_v35, %v1346_v45 }
 0x300   : > { %v1785_v47 = vpop.f32.mrf.mxu0 }
 0x301   : > { %1397 = vst [vmem:[%s2260_s18 + $0x20] sm:$0xff] %v1347_v46  ;;  %v1358_v48 = vadd.f32 %v1785_v47, %v1586_v35 }
 0x302   : > { %v1349_v49 = vpop.f32.mrf.mxu0 }
 0x303   : > { %1400 = vst [vmem:[%s2260_s18 + $0x38] sm:$0xff] %v1358_v48  ;;  %v1350_v50 = vadd.f32 %v1586_v35, %v1349_v49 }
 0x304   : > { %v1788_v51 = vpop.f32.mrf.mxu1 }
 0x305   : > { %1398 = vst [vmem:[%s2260_s18 + $0x28] sm:$0xff] %v1350_v50  ;;  %v1371_v52 = vadd.f32 %v1788_v51, %v1586_v35 }
 0x306   : > { %v1362_v53 = vpop.f32.mrf.mxu1 }
 0x307   : > { %1403 = vst [vmem:[%s2260_s18 + $0x50] sm:$0xff] %v1371_v52  ;;  %v1363_v54 = vadd.f32 %v1586_v35, %v1362_v53 }
 0x308   : > { %v1789_v55 = vpop.f32.mrf.mxu1 }
 0x309   : > { %1401 = vst [vmem:[%s2260_s18 + $0x40] sm:$0xff] %v1363_v54  ;;  %v1374_v56 = vadd.f32 %v1789_v55, %v1586_v35 }
 0x30a   : > { %v1365_v57 = vpop.f32.mrf.mxu1 }
 0x30b   : > { %1404 = vst [vmem:[%s2260_s18 + $0x58] sm:$0xff] %v1374_v56  ;;  %v1366_v58 = vadd.f32 %v1586_v35, %v1365_v57 }
 0x30c   : > { %v1792_v59 = vpop.f32.mrf.mxu1 }
 0x30d   : > { %1402 = vst [vmem:[%s2260_s18 + $0x48] sm:$0xff] %v1366_v58  ;;  %v1387_v60 = vadd.f32 %v1792_v59, %v1586_v35 }
 0x30e   : > { %v1378_v61 = vpop.f32.mrf.mxu1 }
 0x30f   : > { %1407 = vst [vmem:[%s2260_s18 + $0x70] sm:$0xff] %v1387_v60  ;;  %v1379_v62 = vadd.f32 %v1586_v35, %v1378_v61 }
 0x310   : > { %v1793_v63 = vpop.f32.mrf.mxu1 }
 0x311   : > { %1405 = vst [vmem:[%s2260_s18 + $0x60] sm:$0xff] %v1379_v62  ;;  %v1390_v0 = vadd.f32 %v1793_v63, %v1586_v35 }
 0x312   : > { %v1381_v1 = vpop.f32.mrf.mxu1 }
 0x313   : > { %1408 = vst [vmem:[%s2260_s18 + $0x78] sm:$0xff] %v1390_v0  ;;  %v1382_v2 = vadd.f32 %v1586_v35, %v1381_v1 }
 0x315   : > { %1406 = vst [vmem:[%s2260_s18 + $0x68] sm:$0xff] %v1382_v2 }
 0x316 PF: > { %s1601_s27 = sshll.u32 %s2060_s11, 11  ;;  %s1423_s21 = sshll.u32 %s2260_s18, 4  ;;  %s2407_s21 = int_to_ptr.vmem [resolvable:$true] %s1423_s21 }
 0x317   : > { %s2404_s13 = scalar_lea.hbm %s2476_s8, %s1601_s27  ;;  %s2495_s26 = sand.u32 1, %s2040_s28  }
 0x318   : > { %s2411_s16 = scalar_lea.sflag [#allocation5], %s2495_s26  ;;  %s1964_s30 = scalar_lea.vmem %s2407_s21, 2048 }
 0x319   : > { %p1965_p8 = scmp.ne.s32.totalorder %s2407_s21, %s1964_s30  ;;  %s2075_s11 = smov [#allocation4]  }
 0x31a   : > { %s1968_s20 = sshll.u32 %s2075_s11, 4  ;;  %s1969_s20 = int_to_ptr.vmem [resolvable:$false] %s1968_s20 }
 0x31b   : > { %p1966_p9 = pnand %p1965_p8, %p2195_p7  ;;  %s1970_s24 = scalar_lea.vmem %s1969_s20, 4096 }
 0x31c   : > { %p1971_p11 = scmp.lt.s32.totalorder %s2407_s21, %s1969_s20  ;;  %p1972_p13 = scmp.lt.s32.totalorder %s1970_s24, %s1964_s30 }
 0x31d   : > { %p1967_p10 = pneg %p1966_p9 }
 0x31e   : > { %p1973_p0 = por %p1972_p13, %p1971_p11 }
 0x320   : > { %p1974_p1 = pnand %p1973_p0, %p1967_p10 }
 0x322   : > { %1977 = shalt.err (!%p1974_p1)
}
 0x323   : > { %s1978_s18 = scalar_lea.hbm %s2404_s13, 2048  ;;  %s1982_s22 = scalar_lea.hbm %s2476_s8, 4096 }
 0x324   : > { %p1979_p2 = scmp.ne.s32.totalorder %s2404_s13, %s1978_s18  ;;  %p1983_p5 = scmp.lt.s32.totalorder %s2404_s13, %s2476_s8 }
 0x325   : > { %p1984_p6 = scmp.lt.s32.totalorder %s1982_s22, %s1978_s18 }
 0x326   : > { %p1980_p3 = pnand %p1979_p2, %p2195_p7 }
 0x327   : > { %p1985_p8 = por %p1984_p6, %p1983_p5 }
 0x328   : > { %p1981_p4 = pneg %p1980_p3 }
 0x32a   : > { %p1986_p9 = pnand %p1985_p8, %p1981_p4 }
 0x32c   : > { %1989 = shalt.err (!%p1986_p9)
}
 0x32d   : > { %s2076_s0 = smov 128   ;;  %s2077_s12 = smov 8  }
 0x32e   : > { %1826 = dma.vmem_to_hbm [thread:$0]  (%p2195_p7), %s2407_s21, 2048, %s2404_s13, %s2411_s16, %s2076_s0, %s2076_s0, %s2077_s12  }
 0x32f PF: > { %s2496_s26 = sld [smem:[#allocation7_spill]]  ;;  %p1832_p10 = scmp.ge.s32.totalorder %s2072_s14, 2 }
 0x331   : > { %p1829_p11 = pnand %p1832_p10, %p2203_p12 }
 0x333   : > { %p1830_p13 = pneg %p1829_p11 }
 0x335   : > { %s1438_s11 = sand.u32 1, %s2496_s26  }
 0x336   : > { %s1439_s20 = scalar_lea.sflag [#allocation5], %s1438_s11 }
 0x337   : > { %2031 = dma.done.wait (%p1830_p13), %s1439_s20, 2048  }
 0x338   : > { %2033 = vsyncadd (%p1830_p13), %s1439_s20, 4294965248  ;;  %s21_s14 = sadd.s32 1, %s2072_s14   ;;  %s2498_s10 = sld [smem:[#allocation8_spill]] }
 0x339   : > { %p18_p0 = scmp.ge.s32.totalorder %s21_s14, 6   ;;  %s2499_s11 = sld [smem:[#allocation9_spill]] }
 0x33a   : > { %s2500_s12 = sld [smem:[#allocation10_spill]]  ;;  %s2502_s27 = smov %s2040_s28 }
 0x33b   : > { %s2501_s13 = sld [smem:[#allocation11_spill]]  ;;  %s2503_s28 = smov %s2044_s29 }
 0x33c   : > { %s2504_s29 = smov %s2208_s17  ;;  %s2505_s30 = smov %s2052_s9 }
 0x33d   : > { %s2506_s9 = smov %s2211_s15  ;;  %20 = sbr.rel (!%p18_p0) target bundleno = 8 (0x8), region = 147 }
 0x342   :  { %1444 = vsyncpa [#allocation5], 1 }
 0x343   :  { %1446 = vsyncpa [#allocation5 + $0x1], 1 }

</bundles_post_ra>
